<compile_context>
chip_gen: v7x
topology: tpu7x:2x2x1
jax: 0.10.0
libtpu: 0.0.40
codegen_flags: <defaults>
</compile_context>

<pallas_src>
import math

import jax
import jax.numpy as jnp
from jax import lax
from jax.experimental import pallas as pl
from jax.experimental.pallas import tpu as pltpu

HIDDEN = 128          # stand-in for encoder.config.hidden_size
PROJ = 256            # projection_dim (module default)
NUM_HEADS = 4         # module default
NUM_LAYERS = 2        # module default
HEAD_DIM = HIDDEN // NUM_HEADS
LN_EPS = 1e-5
VOCAB = 64


# --------------------------------------------------------------------------
# Fused kernel: embed -> [attn + residual + LayerNorm] x NUM_LAYERS -> MLP.
# Each grid step processes a block of BB sequences ([BB, S, *]).
# --------------------------------------------------------------------------
def _fused_forward_kernel(ids_ref, kbias_ref, embed_ref,
                          wqkv_ref, bqkv_ref, wo_ref, bo_ref,
                          gamma_ref, beta_ref,
                          w1_ref, b1_ref, w2_ref, b2_ref,
                          out_ref):
    BB, S, _ = ids_ref.shape
    H = HIDDEN
    R = BB * S

    # ---- fused token-embedding lookup: one-hot(ids) @ embed --------------
    # Exact row-select (0/1 weights, f32 accumulation).  Replaces the XLA
    # gather + [B,S,H] f32 HBM stream with a tiny int32 stream + 32 KiB table.
    ids = ids_ref[...]                                            # [BB,S,1] i32
    vocab_iota = lax.broadcasted_iota(jnp.int32, (BB, S, VOCAB), 2)
    onehot = (ids == vocab_iota).astype(jnp.float32)              # [BB,S,VOCAB]
    x2d = jnp.dot(onehot.reshape(R, VOCAB), embed_ref[...],
                  preferred_element_type=jnp.float32)             # [R,H] f32

    # key-padding bias replicated once per head: [NH*BB, 1, S]
    kbias = kbias_ref[...]                                        # [BB,1,S] f32
    kbias_h = jnp.concatenate([kbias] * NUM_HEADS, axis=0)

    for l in range(NUM_LAYERS):
        # -- fused QKV in-projection: ONE bf16 MXU matmul, M = BB*S ---------
        qkv = jnp.dot(x2d.astype(jnp.bfloat16), wqkv_ref[l],
                      preferred_element_type=jnp.float32) + bqkv_ref[l]
        # single bf16 cast of the whole qkv buffer (1/sqrt(head_dim) is
        # already folded into the Q projection weights).
        qkv = qkv.astype(jnp.bfloat16).reshape(BB, S, 3 * H)

        # -- head-batched attention: heads folded into the batch axis -------
        def heads_to_batch(base):                                 # -> [NH*BB,S,HD]
            return jnp.concatenate(
                [qkv[:, :, base + h * HEAD_DIM: base + (h + 1) * HEAD_DIM]
                 for h in range(NUM_HEADS)], axis=0)

        q = heads_to_batch(0)
        k = heads_to_batch(H)
        v = heads_to_batch(2 * H)

        # one batched score matmul + one batched p@v matmul per layer
        s = jnp.einsum('bqd,bkd->bqk', q, k,
                       preferred_element_type=jnp.float32)        # [NH*BB,S,S]
        s = s + kbias_h                                           # padded keys -> -1e9
        s_max = jnp.max(s, axis=-1, keepdims=True)
        e = jnp.exp(s - s_max)
        denom = jnp.sum(e, axis=-1, keepdims=True)
        p = (e * pl.reciprocal(denom, approx=True)).astype(jnp.bfloat16)
        ctx_h = jnp.einsum('bqk,bkd->bqd', p, v,
                           preferred_element_type=jnp.float32)    # [NH*BB,S,HD]
        ctx = jnp.concatenate(
            [ctx_h[h * BB:(h + 1) * BB] for h in range(NUM_HEADS)],
            axis=-1)                                              # [BB,S,H]

        # -- single full-K output projection + residual + LayerNorm (f32) ---
        attn = jnp.dot(ctx.reshape(R, H).astype(jnp.bfloat16), wo_ref[l],
                       preferred_element_type=jnp.float32) + bo_ref[l]
        y = x2d + attn
        mean = jnp.mean(y, axis=-1, keepdims=True)
        var = jnp.mean(jnp.square(y - mean), axis=-1, keepdims=True)
        y = (y - mean) * lax.rsqrt(var + LN_EPS)
        x2d = y * gamma_ref[l] + beta_ref[l]

    # ---- projection head: Linear(H,P) -> ReLU -> Linear(P,P) --------------
    h1 = jnp.dot(x2d.astype(jnp.bfloat16), w1_ref[...],
                 preferred_element_type=jnp.float32) + b1_ref[...]
    h1 = jnp.maximum(h1, 0.0)
    o = jnp.dot(h1.astype(jnp.bfloat16), w2_ref[...],
                preferred_element_type=jnp.float32) + b2_ref[...]
    out_ref[...] = o.reshape(BB, S, PROJ).astype(out_ref.dtype)


# --------------------------------------------------------------------------
# Wrapper
# --------------------------------------------------------------------------
def _rep(shape):
    """BlockSpec for an operand replicated (same block) across all grid steps.
    Constant index map -> fetched once, stays VMEM-resident."""
    n = len(shape)
    return pl.BlockSpec(shape, lambda *_: (0,) * n)


def _pick_batch_block(B, S, target_rows=512):
    """Rows per grid step (M = BB*S) are the only free MXU dimension in this
    model, and each grid step costs ~0.35us of fixed overhead, so maximise
    rows per step.  Small batches are intentionally NOT split in half for
    megacore: a second grid step only pays off when it carries hundreds of
    rows of real work."""
    bb = max(1, min(B, target_rows // max(S, 1)))
    while B % bb != 0:
        bb -= 1
    return bb


def simner_forward(params, input_ids, attention_mask):
    # TODO(synk): the pretrained HuggingFace BERT encoder is replaced by a
    # deterministic token-embedding lookup (fused into the kernel as a
    # one-hot matmul); everything downstream of `last_hidden_state`
    # (the module's own attention/LayerNorm/projection layers) runs fused in
    # this single Pallas call.
    B, S = input_ids.shape

    # Keep S a multiple of 8 so the [BB*S, .] <-> [BB, S, .] reshapes inside
    # the kernel stay view-like.  Padded key positions get the -1e9 bias;
    # padded query rows are sliced off afterwards.
    S_pad = max(8, -(-S // 8) * 8)
    if S_pad != S:
        input_ids = jnp.pad(input_ids, ((0, 0), (0, S_pad - S)))
        attention_mask = jnp.pad(attention_mask, ((0, 0), (0, S_pad - S)))

    ids3 = input_ids.astype(jnp.int32)[:, :, None]                # [B,S,1]
    # note: the module's `attn_mask = (1-mask)*-1e9` is computed but unused in
    # the PyTorch forward; only key_padding_mask (= ~mask) affects the output.
    key_bias = ((1.0 - attention_mask.astype(jnp.float32)) * -1e9)[:, None, :]

    BB = _pick_batch_block(B, S_pad)
    lw, pp = params["layers"], params["proj"]
    H = HIDDEN

    out = pl.pallas_call(
        _fused_forward_kernel,
        out_shape=jax.ShapeDtypeStruct((B, S_pad, PROJ), jnp.float32),
        grid=(B // BB,),
        in_specs=[
            pl.BlockSpec((BB, S_pad, 1), lambda b: (b, 0, 0)),    # token ids
            pl.BlockSpec((BB, 1, S_pad), lambda b: (b, 0, 0)),    # key-padding bias
            _rep((VOCAB, H)),                                     # embedding table
            _rep((NUM_LAYERS, H, 3 * H)),                         # wqkv (bf16, Q pre-scaled)
            _rep((NUM_LAYERS, 1, 3 * H)),                         # bqkv
            _rep((NUM_LAYERS, H, H)),                             # wo (bf16)
            _rep((NUM_LAYERS, 1, H)),                             # bo
            _rep((NUM_LAYERS, 1, H)),                             # ln gamma
            _rep((NUM_LAYERS, 1, H)),                             # ln beta
            _rep((H, PROJ)),                                      # w1 (bf16)
            _rep((1, PROJ)),                                      # b1
            _rep((PROJ, PROJ)),                                   # w2 (bf16)
            _rep((1, PROJ)),                                      # b2
        ],
        out_specs=pl.BlockSpec((BB, S_pad, PROJ), lambda b: (b, 0, 0)),
        compiler_params=pltpu.CompilerParams(
            dimension_semantics=("parallel",),
            # ~1 MiB resident weights + ~6 KiB/row of activations at <=512
            # rows/step: 32 MiB gives ample headroom on every generation
            # (v5e default scoped VMEM is 16 MiB; v7x physical VMEM is 64 MiB).
            vmem_limit_bytes=32 * 1024 * 1024,
        ),
    )(ids3, key_bias, params["embed"],
      lw["wqkv"], lw["bqkv"], lw["wo"], lw["bo"], lw["gamma"], lw["beta"],
      pp["w1"], pp["b1"], pp["w2"], pp["b2"])

    if S_pad != S:
        out = out[:, :S, :]
    return out


def init_params(key):
    ks = iter(jax.random.split(key, 16))
    scale = 1.0 / math.sqrt(HEAD_DIM)
    embed = jax.random.normal(next(ks), (VOCAB, HIDDEN), jnp.float32) * 0.02

    wqkv, bqkv, wo, bo, gamma, beta = [], [], [], [], [], []
    for _ in range(NUM_LAYERS):
        w = jax.random.normal(next(ks), (HIDDEN, 3 * HIDDEN), jnp.float32) * 0.02
        b = jnp.zeros((1, 3 * HIDDEN), jnp.float32)
        # fold the 1/sqrt(head_dim) attention scale into the Q projection.
        w = w.at[:, :HIDDEN].multiply(scale)
        b = b.at[:, :HIDDEN].multiply(scale)
        wqkv.append(w)
        bqkv.append(b)
        wo.append(jax.random.normal(next(ks), (HIDDEN, HIDDEN), jnp.float32) * 0.02)
        bo.append(jnp.zeros((1, HIDDEN), jnp.float32))
        gamma.append(jnp.ones((1, HIDDEN), jnp.float32))
        beta.append(jnp.zeros((1, HIDDEN), jnp.float32))

    layers = {
        "wqkv": jnp.stack(wqkv).astype(jnp.bfloat16),   # matmul weights in bf16
        "bqkv": jnp.stack(bqkv),
        "wo": jnp.stack(wo).astype(jnp.bfloat16),
        "bo": jnp.stack(bo),
        "gamma": jnp.stack(gamma),
        "beta": jnp.stack(beta),
    }
    proj = {
        "w1": (jax.random.normal(next(ks), (HIDDEN, PROJ), jnp.float32) * 0.02
               ).astype(jnp.bfloat16),
        "b1": jnp.zeros((1, PROJ), jnp.float32),
        "w2": (jax.random.normal(next(ks), (PROJ, PROJ), jnp.float32) * 0.02
               ).astype(jnp.bfloat16),
        "b2": jnp.zeros((1, PROJ), jnp.float32),
    }
    return {"embed": embed, "layers": layers, "proj": proj}


if __name__ == "__main__":
    key = jax.random.PRNGKey(0)
    pkey, ikey = jax.random.split(key)
    B, S = 2, 8
    params = init_params(pkey)
    input_ids = jax.random.randint(ikey, (B, S), 0, VOCAB)
    # last 2 tokens of each sequence are padding
    attention_mask = jnp.concatenate(
        [jnp.ones((B, S - 2), jnp.int32), jnp.zeros((B, 2), jnp.int32)], axis=1)

    out = simner_forward(params, input_ids, attention_mask)
    jax.block_until_ready(out)
    assert out.shape == (B, S, PROJ), out.shape
    assert out.dtype == jnp.float32
    print("KERNEL_OK")
</pallas_src>

<mosaic_0001>
module attributes {stable_mosaic.version = 11 : i64} {
  func.func @_fused_forward_kernel(%arg0: i32, %arg1: memref<2x8x1xi32, #tpu.memory_space<vmem>>, %arg2: memref<2x1x8xf32, #tpu.memory_space<vmem>>, %arg3: memref<64x128xf32, #tpu.memory_space<vmem>>, %arg4: memref<2x128x384xbf16, #tpu.memory_space<vmem>>, %arg5: memref<2x1x384xf32, #tpu.memory_space<vmem>>, %arg6: memref<2x128x128xbf16, #tpu.memory_space<vmem>>, %arg7: memref<2x1x128xf32, #tpu.memory_space<vmem>>, %arg8: memref<2x1x128xf32, #tpu.memory_space<vmem>>, %arg9: memref<2x1x128xf32, #tpu.memory_space<vmem>>, %arg10: memref<128x256xbf16, #tpu.memory_space<vmem>>, %arg11: memref<1x256xf32, #tpu.memory_space<vmem>>, %arg12: memref<256x256xbf16, #tpu.memory_space<vmem>>, %arg13: memref<1x256xf32, #tpu.memory_space<vmem>>, %arg14: memref<2x8x256xf32, #tpu.memory_space<vmem>>) attributes {dimension_semantics = [#tpu.dimension_semantics<parallel>], iteration_bounds = array<i64: 1>, scalar_prefetch = 0 : i64, scratch_operands = 0 : i64, tpu.core_type = #tpu.core_type<tc>, window_params = [{transform_indices = @transform_0, window_bounds = array<i64: 2, 8, 1>}, {transform_indices = @transform_1, window_bounds = array<i64: 2, 1, 8>}, {pipeline_mode = #tpu.pipeline_mode<synchronous>, transform_indices = @transform_2, window_bounds = array<i64: 64, 128>}, {pipeline_mode = #tpu.pipeline_mode<synchronous>, transform_indices = @transform_3, window_bounds = array<i64: 2, 128, 384>}, {pipeline_mode = #tpu.pipeline_mode<synchronous>, transform_indices = @transform_4, window_bounds = array<i64: 2, 1, 384>}, {pipeline_mode = #tpu.pipeline_mode<synchronous>, transform_indices = @transform_5, window_bounds = array<i64: 2, 128, 128>}, {pipeline_mode = #tpu.pipeline_mode<synchronous>, transform_indices = @transform_6, window_bounds = array<i64: 2, 1, 128>}, {pipeline_mode = #tpu.pipeline_mode<synchronous>, transform_indices = @transform_7, window_bounds = array<i64: 2, 1, 128>}, {pipeline_mode = #tpu.pipeline_mode<synchronous>, transform_indices = @transform_8, window_bounds = array<i64: 2, 1, 128>}, {pipeline_mode = #tpu.pipeline_mode<synchronous>, transform_indices = @transform_9, window_bounds = array<i64: 128, 256>}, {pipeline_mode = #tpu.pipeline_mode<synchronous>, transform_indices = @transform_10, window_bounds = array<i64: 1, 256>}, {pipeline_mode = #tpu.pipeline_mode<synchronous>, transform_indices = @transform_11, window_bounds = array<i64: 256, 256>}, {pipeline_mode = #tpu.pipeline_mode<synchronous>, transform_indices = @transform_12, window_bounds = array<i64: 1, 256>}, {transform_indices = @transform_13, window_bounds = array<i64: 2, 8, 256>}]} {
    %c0 = arith.constant 0 : index
    %c0_0 = arith.constant 0 : index
    %c0_1 = arith.constant 0 : index
    %0 = vector.load %arg1[%c0, %c0_0, %c0_1] : memref<2x8x1xi32, #tpu.memory_space<vmem>>, vector<2x8x1xi32>
    %1 = tpu.iota {dimensions = array<i32: 2>} : vector<2x8x64xi32>
    %2 = vector.broadcast %0 : vector<2x8x1xi32> to vector<2x8x64xi32>
    %3 = arith.cmpi eq, %2, %1 : vector<2x8x64xi32>
    %4 = arith.extui %3 : vector<2x8x64xi1> to vector<2x8x64xi32>
    %5 = arith.sitofp %4 : vector<2x8x64xi32> to vector<2x8x64xf32>
    %6 = vector.shape_cast %5 : vector<2x8x64xf32> to vector<16x64xf32>
    %c0_2 = arith.constant 0 : index
    %c0_3 = arith.constant 0 : index
    %7 = vector.load %arg3[%c0_2, %c0_3] : memref<64x128xf32, #tpu.memory_space<vmem>>, vector<64x128xf32>
    %cst = arith.constant dense<0.000000e+00> : vector<16x128xf32>
    %8 = tpu.matmul %6, %7, %cst {dimension_numbers = #tpu.dot_dimension_numbers<[1], [0], [0], [1], [0, 0, 1, 1], [], []>} : vector<16x64xf32>, vector<64x128xf32>, vector<16x128xf32> -> vector<16x128xf32>
    %c0_4 = arith.constant 0 : index
    %c0_5 = arith.constant 0 : index
    %c0_6 = arith.constant 0 : index
    %9 = vector.load %arg2[%c0_4, %c0_5, %c0_6] : memref<2x1x8xf32, #tpu.memory_space<vmem>>, vector<2x1x8xf32>
    %10 = tpu.concatenate %9, %9, %9, %9 in 0 : vector<2x1x8xf32>, vector<2x1x8xf32>, vector<2x1x8xf32>, vector<2x1x8xf32> -> vector<8x1x8xf32>
    %11 = arith.truncf %8 : vector<16x128xf32> to vector<16x128xbf16>
    %c0_7 = arith.constant 0 : index
    %c0_8 = arith.constant 0 : index
    %c0_9 = arith.constant 0 : index
    %12 = vector.load %arg4[%c0_7, %c0_8, %c0_9] : memref<2x128x384xbf16, #tpu.memory_space<vmem>>, vector<1x128x384xbf16>
    %13 = vector.shape_cast %12 : vector<1x128x384xbf16> to vector<128x384xbf16>
    %cst_10 = arith.constant dense<0.000000e+00> : vector<16x384xf32>
    %14 = tpu.matmul %11, %13, %cst_10 {dimension_numbers = #tpu.dot_dimension_numbers<[1], [0], [0], [1], [0, 0, 1, 1], [], []>} : vector<16x128xbf16>, vector<128x384xbf16>, vector<16x384xf32> -> vector<16x384xf32>
    %c0_11 = arith.constant 0 : index
    %c0_12 = arith.constant 0 : index
    %c0_13 = arith.constant 0 : index
    %15 = vector.load %arg5[%c0_11, %c0_12, %c0_13] : memref<2x1x384xf32, #tpu.memory_space<vmem>>, vector<1x1x384xf32>
    %16 = vector.shape_cast %15 : vector<1x1x384xf32> to vector<1x384xf32>
    %17 = vector.broadcast %16 : vector<1x384xf32> to vector<16x384xf32>
    %18 = arith.addf %14, %17 : vector<16x384xf32>
    %19 = arith.truncf %18 : vector<16x384xf32> to vector<16x384xbf16>
    %20 = vector.shape_cast %19 : vector<16x384xbf16> to vector<2x8x384xbf16>
    %21 = vector.extract_strided_slice %20 {offsets = [0, 0, 0], sizes = [2, 8, 32], strides = [1, 1, 1]} : vector<2x8x384xbf16> to vector<2x8x32xbf16>
    %22 = vector.extract_strided_slice %20 {offsets = [0, 0, 32], sizes = [2, 8, 32], strides = [1, 1, 1]} : vector<2x8x384xbf16> to vector<2x8x32xbf16>
    %23 = vector.extract_strided_slice %20 {offsets = [0, 0, 64], sizes = [2, 8, 32], strides = [1, 1, 1]} : vector<2x8x384xbf16> to vector<2x8x32xbf16>
    %24 = vector.extract_strided_slice %20 {offsets = [0, 0, 96], sizes = [2, 8, 32], strides = [1, 1, 1]} : vector<2x8x384xbf16> to vector<2x8x32xbf16>
    %25 = tpu.concatenate %21, %22, %23, %24 in 0 : vector<2x8x32xbf16>, vector<2x8x32xbf16>, vector<2x8x32xbf16>, vector<2x8x32xbf16> -> vector<8x8x32xbf16>
    %26 = vector.extract_strided_slice %20 {offsets = [0, 0, 128], sizes = [2, 8, 32], strides = [1, 1, 1]} : vector<2x8x384xbf16> to vector<2x8x32xbf16>
    %27 = vector.extract_strided_slice %20 {offsets = [0, 0, 160], sizes = [2, 8, 32], strides = [1, 1, 1]} : vector<2x8x384xbf16> to vector<2x8x32xbf16>
    %28 = vector.extract_strided_slice %20 {offsets = [0, 0, 192], sizes = [2, 8, 32], strides = [1, 1, 1]} : vector<2x8x384xbf16> to vector<2x8x32xbf16>
    %29 = vector.extract_strided_slice %20 {offsets = [0, 0, 224], sizes = [2, 8, 32], strides = [1, 1, 1]} : vector<2x8x384xbf16> to vector<2x8x32xbf16>
    %30 = tpu.concatenate %26, %27, %28, %29 in 0 : vector<2x8x32xbf16>, vector<2x8x32xbf16>, vector<2x8x32xbf16>, vector<2x8x32xbf16> -> vector<8x8x32xbf16>
    %31 = vector.extract_strided_slice %20 {offsets = [0, 0, 256], sizes = [2, 8, 32], strides = [1, 1, 1]} : vector<2x8x384xbf16> to vector<2x8x32xbf16>
    %32 = vector.extract_strided_slice %20 {offsets = [0, 0, 288], sizes = [2, 8, 32], strides = [1, 1, 1]} : vector<2x8x384xbf16> to vector<2x8x32xbf16>
    %33 = vector.extract_strided_slice %20 {offsets = [0, 0, 320], sizes = [2, 8, 32], strides = [1, 1, 1]} : vector<2x8x384xbf16> to vector<2x8x32xbf16>
    %34 = vector.extract_strided_slice %20 {offsets = [0, 0, 352], sizes = [2, 8, 32], strides = [1, 1, 1]} : vector<2x8x384xbf16> to vector<2x8x32xbf16>
    %35 = tpu.concatenate %31, %32, %33, %34 in 0 : vector<2x8x32xbf16>, vector<2x8x32xbf16>, vector<2x8x32xbf16>, vector<2x8x32xbf16> -> vector<8x8x32xbf16>
    "tpu.trace_start"() <{level = 10 : i32, message = "bqd,bkd->bqk"}> : () -> ()
    %cst_14 = arith.constant dense<0.000000e+00> : vector<8x8x8xf32>
    %36 = tpu.matmul %25, %30, %cst_14 {dimension_numbers = #tpu.dot_dimension_numbers<[2], [2], [1], [1], [0, 0, 0, 1, 1, 1], [0], [0]>} : vector<8x8x32xbf16>, vector<8x8x32xbf16>, vector<8x8x8xf32> -> vector<8x8x8xf32>
    "tpu.trace_stop"() : () -> ()
    %37 = vector.broadcast %10 : vector<8x1x8xf32> to vector<8x8x8xf32>
    %38 = arith.addf %36, %37 : vector<8x8x8xf32>
    %cst_15 = arith.constant dense<0xFF800000> : vector<8x8xf32>
    %39 = vector.multi_reduction <maximumf>, %38, %cst_15 [2] : vector<8x8x8xf32> to vector<8x8xf32>
    %40 = vector.shape_cast %39 : vector<8x8xf32> to vector<8x8x1xf32>
    %41 = vector.broadcast %40 : vector<8x8x1xf32> to vector<8x8x8xf32>
    %42 = arith.subf %38, %41 : vector<8x8x8xf32>
    %43 = math.exp %42 : vector<8x8x8xf32>
    %cst_16 = arith.constant dense<0.000000e+00> : vector<8x8xf32>
    %44 = vector.multi_reduction <add>, %43, %cst_16 [2] : vector<8x8x8xf32> to vector<8x8xf32>
    %45 = vector.shape_cast %44 : vector<8x8xf32> to vector<8x8x1xf32>
    %46 = tpu.reciprocal %45 {approx = true} : vector<8x8x1xf32> -> vector<8x8x1xf32>
    %47 = vector.broadcast %46 : vector<8x8x1xf32> to vector<8x8x8xf32>
    %48 = arith.mulf %43, %47 : vector<8x8x8xf32>
    %49 = arith.truncf %48 : vector<8x8x8xf32> to vector<8x8x8xbf16>
    "tpu.trace_start"() <{level = 10 : i32, message = "bqk,bkd->bqd"}> : () -> ()
    %cst_17 = arith.constant dense<0.000000e+00> : vector<8x8x32xf32>
    %50 = tpu.matmul %49, %35, %cst_17 {dimension_numbers = #tpu.dot_dimension_numbers<[2], [1], [1], [2], [0, 0, 0, 1, 1, 2], [0], [0]>} : vector<8x8x8xbf16>, vector<8x8x32xbf16>, vector<8x8x32xf32> -> vector<8x8x32xf32>
    "tpu.trace_stop"() : () -> ()
    %51 = vector.extract_strided_slice %50 {offsets = [0, 0, 0], sizes = [2, 8, 32], strides = [1, 1, 1]} : vector<8x8x32xf32> to vector<2x8x32xf32>
    %52 = vector.extract_strided_slice %50 {offsets = [2, 0, 0], sizes = [2, 8, 32], strides = [1, 1, 1]} : vector<8x8x32xf32> to vector<2x8x32xf32>
    %53 = vector.extract_strided_slice %50 {offsets = [4, 0, 0], sizes = [2, 8, 32], strides = [1, 1, 1]} : vector<8x8x32xf32> to vector<2x8x32xf32>
    %54 = vector.extract_strided_slice %50 {offsets = [6, 0, 0], sizes = [2, 8, 32], strides = [1, 1, 1]} : vector<8x8x32xf32> to vector<2x8x32xf32>
    %55 = tpu.concatenate %51, %52, %53, %54 in 2 : vector<2x8x32xf32>, vector<2x8x32xf32>, vector<2x8x32xf32>, vector<2x8x32xf32> -> vector<2x8x128xf32>
    %56 = vector.shape_cast %55 : vector<2x8x128xf32> to vector<16x128xf32>
    %57 = arith.truncf %56 : vector<16x128xf32> to vector<16x128xbf16>
    %c0_18 = arith.constant 0 : index
    %c0_19 = arith.constant 0 : index
    %c0_20 = arith.constant 0 : index
    %58 = vector.load %arg6[%c0_18, %c0_19, %c0_20] : memref<2x128x128xbf16, #tpu.memory_space<vmem>>, vector<1x128x128xbf16>
    %59 = vector.shape_cast %58 : vector<1x128x128xbf16> to vector<128x128xbf16>
    %cst_21 = arith.constant dense<0.000000e+00> : vector<16x128xf32>
    %60 = tpu.matmul %57, %59, %cst_21 {dimension_numbers = #tpu.dot_dimension_numbers<[1], [0], [0], [1], [0, 0, 1, 1], [], []>} : vector<16x128xbf16>, vector<128x128xbf16>, vector<16x128xf32> -> vector<16x128xf32>
    %c0_22 = arith.constant 0 : index
    %c0_23 = arith.constant 0 : index
    %c0_24 = arith.constant 0 : index
    %61 = vector.load %arg7[%c0_22, %c0_23, %c0_24] : memref<2x1x128xf32, #tpu.memory_space<vmem>>, vector<1x1x128xf32>
    %62 = vector.shape_cast %61 : vector<1x1x128xf32> to vector<1x128xf32>
    %63 = vector.broadcast %62 : vector<1x128xf32> to vector<16x128xf32>
    %64 = arith.addf %60, %63 : vector<16x128xf32>
    %65 = arith.addf %8, %64 : vector<16x128xf32>
    %cst_25 = arith.constant dense<0.000000e+00> : vector<16xf32>
    %66 = vector.multi_reduction <add>, %65, %cst_25 [1] : vector<16x128xf32> to vector<16xf32>
    %67 = vector.shape_cast %66 : vector<16xf32> to vector<16x1xf32>
    %cst_26 = arith.constant 1.280000e+02 : f32
    %68 = vector.broadcast %cst_26 : f32 to vector<16x1xf32>
    %69 = arith.divf %67, %68 : vector<16x1xf32>
    %70 = vector.broadcast %69 : vector<16x1xf32> to vector<16x128xf32>
    %71 = arith.subf %65, %70 : vector<16x128xf32>
    %72 = arith.mulf %71, %71 : vector<16x128xf32>
    %cst_27 = arith.constant dense<0.000000e+00> : vector<16xf32>
    %73 = vector.multi_reduction <add>, %72, %cst_27 [1] : vector<16x128xf32> to vector<16xf32>
    %74 = vector.shape_cast %73 : vector<16xf32> to vector<16x1xf32>
    %cst_28 = arith.constant 1.280000e+02 : f32
    %75 = vector.broadcast %cst_28 : f32 to vector<16x1xf32>
    %76 = arith.divf %74, %75 : vector<16x1xf32>
    %77 = vector.broadcast %69 : vector<16x1xf32> to vector<16x128xf32>
    %78 = arith.subf %65, %77 : vector<16x128xf32>
    %cst_29 = arith.constant 9.99999974E-6 : f32
    %79 = vector.broadcast %cst_29 : f32 to vector<16x1xf32>
    %80 = arith.addf %76, %79 : vector<16x1xf32>
    %81 = math.rsqrt %80 : vector<16x1xf32>
    %82 = vector.broadcast %81 : vector<16x1xf32> to vector<16x128xf32>
    %83 = arith.mulf %78, %82 : vector<16x128xf32>
    %c0_30 = arith.constant 0 : index
    %c0_31 = arith.constant 0 : index
    %c0_32 = arith.constant 0 : index
    %84 = vector.load %arg8[%c0_30, %c0_31, %c0_32] : memref<2x1x128xf32, #tpu.memory_space<vmem>>, vector<1x1x128xf32>
    %85 = vector.shape_cast %84 : vector<1x1x128xf32> to vector<1x128xf32>
    %86 = vector.broadcast %85 : vector<1x128xf32> to vector<16x128xf32>
    %87 = arith.mulf %83, %86 : vector<16x128xf32>
    %c0_33 = arith.constant 0 : index
    %c0_34 = arith.constant 0 : index
    %c0_35 = arith.constant 0 : index
    %88 = vector.load %arg9[%c0_33, %c0_34, %c0_35] : memref<2x1x128xf32, #tpu.memory_space<vmem>>, vector<1x1x128xf32>
    %89 = vector.shape_cast %88 : vector<1x1x128xf32> to vector<1x128xf32>
    %90 = vector.broadcast %89 : vector<1x128xf32> to vector<16x128xf32>
    %91 = arith.addf %87, %90 : vector<16x128xf32>
    %92 = arith.truncf %91 : vector<16x128xf32> to vector<16x128xbf16>
    %c1 = arith.constant 1 : index
    %c0_36 = arith.constant 0 : index
    %c0_37 = arith.constant 0 : index
    %93 = vector.load %arg4[%c1, %c0_36, %c0_37] : memref<2x128x384xbf16, #tpu.memory_space<vmem>>, vector<1x128x384xbf16>
    %94 = vector.shape_cast %93 : vector<1x128x384xbf16> to vector<128x384xbf16>
    %cst_38 = arith.constant dense<0.000000e+00> : vector<16x384xf32>
    %95 = tpu.matmul %92, %94, %cst_38 {dimension_numbers = #tpu.dot_dimension_numbers<[1], [0], [0], [1], [0, 0, 1, 1], [], []>} : vector<16x128xbf16>, vector<128x384xbf16>, vector<16x384xf32> -> vector<16x384xf32>
    %c1_39 = arith.constant 1 : index
    %c0_40 = arith.constant 0 : index
    %c0_41 = arith.constant 0 : index
    %96 = vector.load %arg5[%c1_39, %c0_40, %c0_41] : memref<2x1x384xf32, #tpu.memory_space<vmem>>, vector<1x1x384xf32>
    %97 = vector.shape_cast %96 : vector<1x1x384xf32> to vector<1x384xf32>
    %98 = vector.broadcast %97 : vector<1x384xf32> to vector<16x384xf32>
    %99 = arith.addf %95, %98 : vector<16x384xf32>
    %100 = arith.truncf %99 : vector<16x384xf32> to vector<16x384xbf16>
    %101 = vector.shape_cast %100 : vector<16x384xbf16> to vector<2x8x384xbf16>
    %102 = vector.extract_strided_slice %101 {offsets = [0, 0, 0], sizes = [2, 8, 32], strides = [1, 1, 1]} : vector<2x8x384xbf16> to vector<2x8x32xbf16>
    %103 = vector.extract_strided_slice %101 {offsets = [0, 0, 32], sizes = [2, 8, 32], strides = [1, 1, 1]} : vector<2x8x384xbf16> to vector<2x8x32xbf16>
    %104 = vector.extract_strided_slice %101 {offsets = [0, 0, 64], sizes = [2, 8, 32], strides = [1, 1, 1]} : vector<2x8x384xbf16> to vector<2x8x32xbf16>
    %105 = vector.extract_strided_slice %101 {offsets = [0, 0, 96], sizes = [2, 8, 32], strides = [1, 1, 1]} : vector<2x8x384xbf16> to vector<2x8x32xbf16>
    %106 = tpu.concatenate %102, %103, %104, %105 in 0 : vector<2x8x32xbf16>, vector<2x8x32xbf16>, vector<2x8x32xbf16>, vector<2x8x32xbf16> -> vector<8x8x32xbf16>
    %107 = vector.extract_strided_slice %101 {offsets = [0, 0, 128], sizes = [2, 8, 32], strides = [1, 1, 1]} : vector<2x8x384xbf16> to vector<2x8x32xbf16>
    %108 = vector.extract_strided_slice %101 {offsets = [0, 0, 160], sizes = [2, 8, 32], strides = [1, 1, 1]} : vector<2x8x384xbf16> to vector<2x8x32xbf16>
    %109 = vector.extract_strided_slice %101 {offsets = [0, 0, 192], sizes = [2, 8, 32], strides = [1, 1, 1]} : vector<2x8x384xbf16> to vector<2x8x32xbf16>
    %110 = vector.extract_strided_slice %101 {offsets = [0, 0, 224], sizes = [2, 8, 32], strides = [1, 1, 1]} : vector<2x8x384xbf16> to vector<2x8x32xbf16>
    %111 = tpu.concatenate %107, %108, %109, %110 in 0 : vector<2x8x32xbf16>, vector<2x8x32xbf16>, vector<2x8x32xbf16>, vector<2x8x32xbf16> -> vector<8x8x32xbf16>
    %112 = vector.extract_strided_slice %101 {offsets = [0, 0, 256], sizes = [2, 8, 32], strides = [1, 1, 1]} : vector<2x8x384xbf16> to vector<2x8x32xbf16>
    %113 = vector.extract_strided_slice %101 {offsets = [0, 0, 288], sizes = [2, 8, 32], strides = [1, 1, 1]} : vector<2x8x384xbf16> to vector<2x8x32xbf16>
    %114 = vector.extract_strided_slice %101 {offsets = [0, 0, 320], sizes = [2, 8, 32], strides = [1, 1, 1]} : vector<2x8x384xbf16> to vector<2x8x32xbf16>
    %115 = vector.extract_strided_slice %101 {offsets = [0, 0, 352], sizes = [2, 8, 32], strides = [1, 1, 1]} : vector<2x8x384xbf16> to vector<2x8x32xbf16>
    %116 = tpu.concatenate %112, %113, %114, %115 in 0 : vector<2x8x32xbf16>, vector<2x8x32xbf16>, vector<2x8x32xbf16>, vector<2x8x32xbf16> -> vector<8x8x32xbf16>
    "tpu.trace_start"() <{level = 10 : i32, message = "bqd,bkd->bqk"}> : () -> ()
    %cst_42 = arith.constant dense<0.000000e+00> : vector<8x8x8xf32>
    %117 = tpu.matmul %106, %111, %cst_42 {dimension_numbers = #tpu.dot_dimension_numbers<[2], [2], [1], [1], [0, 0, 0, 1, 1, 1], [0], [0]>} : vector<8x8x32xbf16>, vector<8x8x32xbf16>, vector<8x8x8xf32> -> vector<8x8x8xf32>
    "tpu.trace_stop"() : () -> ()
    %118 = vector.broadcast %10 : vector<8x1x8xf32> to vector<8x8x8xf32>
    %119 = arith.addf %117, %118 : vector<8x8x8xf32>
    %cst_43 = arith.constant dense<0xFF800000> : vector<8x8xf32>
    %120 = vector.multi_reduction <maximumf>, %119, %cst_43 [2] : vector<8x8x8xf32> to vector<8x8xf32>
    %121 = vector.shape_cast %120 : vector<8x8xf32> to vector<8x8x1xf32>
    %122 = vector.broadcast %121 : vector<8x8x1xf32> to vector<8x8x8xf32>
    %123 = arith.subf %119, %122 : vector<8x8x8xf32>
    %124 = math.exp %123 : vector<8x8x8xf32>
    %cst_44 = arith.constant dense<0.000000e+00> : vector<8x8xf32>
    %125 = vector.multi_reduction <add>, %124, %cst_44 [2] : vector<8x8x8xf32> to vector<8x8xf32>
    %126 = vector.shape_cast %125 : vector<8x8xf32> to vector<8x8x1xf32>
    %127 = tpu.reciprocal %126 {approx = true} : vector<8x8x1xf32> -> vector<8x8x1xf32>
    %128 = vector.broadcast %127 : vector<8x8x1xf32> to vector<8x8x8xf32>
    %129 = arith.mulf %124, %128 : vector<8x8x8xf32>
    %130 = arith.truncf %129 : vector<8x8x8xf32> to vector<8x8x8xbf16>
    "tpu.trace_start"() <{level = 10 : i32, message = "bqk,bkd->bqd"}> : () -> ()
    %cst_45 = arith.constant dense<0.000000e+00> : vector<8x8x32xf32>
    %131 = tpu.matmul %130, %116, %cst_45 {dimension_numbers = #tpu.dot_dimension_numbers<[2], [1], [1], [2], [0, 0, 0, 1, 1, 2], [0], [0]>} : vector<8x8x8xbf16>, vector<8x8x32xbf16>, vector<8x8x32xf32> -> vector<8x8x32xf32>
    "tpu.trace_stop"() : () -> ()
    %132 = vector.extract_strided_slice %131 {offsets = [0, 0, 0], sizes = [2, 8, 32], strides = [1, 1, 1]} : vector<8x8x32xf32> to vector<2x8x32xf32>
    %133 = vector.extract_strided_slice %131 {offsets = [2, 0, 0], sizes = [2, 8, 32], strides = [1, 1, 1]} : vector<8x8x32xf32> to vector<2x8x32xf32>
    %134 = vector.extract_strided_slice %131 {offsets = [4, 0, 0], sizes = [2, 8, 32], strides = [1, 1, 1]} : vector<8x8x32xf32> to vector<2x8x32xf32>
    %135 = vector.extract_strided_slice %131 {offsets = [6, 0, 0], sizes = [2, 8, 32], strides = [1, 1, 1]} : vector<8x8x32xf32> to vector<2x8x32xf32>
    %136 = tpu.concatenate %132, %133, %134, %135 in 2 : vector<2x8x32xf32>, vector<2x8x32xf32>, vector<2x8x32xf32>, vector<2x8x32xf32> -> vector<2x8x128xf32>
    %137 = vector.shape_cast %136 : vector<2x8x128xf32> to vector<16x128xf32>
    %138 = arith.truncf %137 : vector<16x128xf32> to vector<16x128xbf16>
    %c1_46 = arith.constant 1 : index
    %c0_47 = arith.constant 0 : index
    %c0_48 = arith.constant 0 : index
    %139 = vector.load %arg6[%c1_46, %c0_47, %c0_48] : memref<2x128x128xbf16, #tpu.memory_space<vmem>>, vector<1x128x128xbf16>
    %140 = vector.shape_cast %139 : vector<1x128x128xbf16> to vector<128x128xbf16>
    %cst_49 = arith.constant dense<0.000000e+00> : vector<16x128xf32>
    %141 = tpu.matmul %138, %140, %cst_49 {dimension_numbers = #tpu.dot_dimension_numbers<[1], [0], [0], [1], [0, 0, 1, 1], [], []>} : vector<16x128xbf16>, vector<128x128xbf16>, vector<16x128xf32> -> vector<16x128xf32>
    %c1_50 = arith.constant 1 : index
    %c0_51 = arith.constant 0 : index
    %c0_52 = arith.constant 0 : index
    %142 = vector.load %arg7[%c1_50, %c0_51, %c0_52] : memref<2x1x128xf32, #tpu.memory_space<vmem>>, vector<1x1x128xf32>
    %143 = vector.shape_cast %142 : vector<1x1x128xf32> to vector<1x128xf32>
    %144 = vector.broadcast %143 : vector<1x128xf32> to vector<16x128xf32>
    %145 = arith.addf %141, %144 : vector<16x128xf32>
    %146 = arith.addf %91, %145 : vector<16x128xf32>
    %cst_53 = arith.constant dense<0.000000e+00> : vector<16xf32>
    %147 = vector.multi_reduction <add>, %146, %cst_53 [1] : vector<16x128xf32> to vector<16xf32>
    %148 = vector.shape_cast %147 : vector<16xf32> to vector<16x1xf32>
    %cst_54 = arith.constant 1.280000e+02 : f32
    %149 = vector.broadcast %cst_54 : f32 to vector<16x1xf32>
    %150 = arith.divf %148, %149 : vector<16x1xf32>
    %151 = vector.broadcast %150 : vector<16x1xf32> to vector<16x128xf32>
    %152 = arith.subf %146, %151 : vector<16x128xf32>
    %153 = arith.mulf %152, %152 : vector<16x128xf32>
    %cst_55 = arith.constant dense<0.000000e+00> : vector<16xf32>
    %154 = vector.multi_reduction <add>, %153, %cst_55 [1] : vector<16x128xf32> to vector<16xf32>
    %155 = vector.shape_cast %154 : vector<16xf32> to vector<16x1xf32>
    %cst_56 = arith.constant 1.280000e+02 : f32
    %156 = vector.broadcast %cst_56 : f32 to vector<16x1xf32>
    %157 = arith.divf %155, %156 : vector<16x1xf32>
    %158 = vector.broadcast %150 : vector<16x1xf32> to vector<16x128xf32>
    %159 = arith.subf %146, %158 : vector<16x128xf32>
    %cst_57 = arith.constant 9.99999974E-6 : f32
    %160 = vector.broadcast %cst_57 : f32 to vector<16x1xf32>
    %161 = arith.addf %157, %160 : vector<16x1xf32>
    %162 = math.rsqrt %161 : vector<16x1xf32>
    %163 = vector.broadcast %162 : vector<16x1xf32> to vector<16x128xf32>
    %164 = arith.mulf %159, %163 : vector<16x128xf32>
    %c1_58 = arith.constant 1 : index
    %c0_59 = arith.constant 0 : index
    %c0_60 = arith.constant 0 : index
    %165 = vector.load %arg8[%c1_58, %c0_59, %c0_60] : memref<2x1x128xf32, #tpu.memory_space<vmem>>, vector<1x1x128xf32>
    %166 = vector.shape_cast %165 : vector<1x1x128xf32> to vector<1x128xf32>
    %167 = vector.broadcast %166 : vector<1x128xf32> to vector<16x128xf32>
    %168 = arith.mulf %164, %167 : vector<16x128xf32>
    %c1_61 = arith.constant 1 : index
    %c0_62 = arith.constant 0 : index
    %c0_63 = arith.constant 0 : index
    %169 = vector.load %arg9[%c1_61, %c0_62, %c0_63] : memref<2x1x128xf32, #tpu.memory_space<vmem>>, vector<1x1x128xf32>
    %170 = vector.shape_cast %169 : vector<1x1x128xf32> to vector<1x128xf32>
    %171 = vector.broadcast %170 : vector<1x128xf32> to vector<16x128xf32>
    %172 = arith.addf %168, %171 : vector<16x128xf32>
    %173 = arith.truncf %172 : vector<16x128xf32> to vector<16x128xbf16>
    %c0_64 = arith.constant 0 : index
    %c0_65 = arith.constant 0 : index
    %174 = vector.load %arg10[%c0_64, %c0_65] : memref<128x256xbf16, #tpu.memory_space<vmem>>, vector<128x256xbf16>
    %cst_66 = arith.constant dense<0.000000e+00> : vector<16x256xf32>
    %175 = tpu.matmul %173, %174, %cst_66 {dimension_numbers = #tpu.dot_dimension_numbers<[1], [0], [0], [1], [0, 0, 1, 1], [], []>} : vector<16x128xbf16>, vector<128x256xbf16>, vector<16x256xf32> -> vector<16x256xf32>
    %c0_67 = arith.constant 0 : index
    %c0_68 = arith.constant 0 : index
    %176 = vector.load %arg11[%c0_67, %c0_68] : memref<1x256xf32, #tpu.memory_space<vmem>>, vector<1x256xf32>
    %177 = vector.broadcast %176 : vector<1x256xf32> to vector<16x256xf32>
    %178 = arith.addf %175, %177 : vector<16x256xf32>
    %cst_69 = arith.constant 0.000000e+00 : f32
    %179 = vector.broadcast %cst_69 : f32 to vector<16x256xf32>
    %180 = arith.maximumf %178, %179 : vector<16x256xf32>
    %181 = arith.truncf %180 : vector<16x256xf32> to vector<16x256xbf16>
    %c0_70 = arith.constant 0 : index
    %c0_71 = arith.constant 0 : index
    %182 = vector.load %arg12[%c0_70, %c0_71] : memref<256x256xbf16, #tpu.memory_space<vmem>>, vector<256x256xbf16>
    %cst_72 = arith.constant dense<0.000000e+00> : vector<16x256xf32>
    %183 = tpu.matmul %181, %182, %cst_72 {dimension_numbers = #tpu.dot_dimension_numbers<[1], [0], [0], [1], [0, 0, 1, 1], [], []>} : vector<16x256xbf16>, vector<256x256xbf16>, vector<16x256xf32> -> vector<16x256xf32>
    %c0_73 = arith.constant 0 : index
    %c0_74 = arith.constant 0 : index
    %184 = vector.load %arg13[%c0_73, %c0_74] : memref<1x256xf32, #tpu.memory_space<vmem>>, vector<1x256xf32>
    %185 = vector.broadcast %184 : vector<1x256xf32> to vector<16x256xf32>
    %186 = arith.addf %183, %185 : vector<16x256xf32>
    %187 = vector.shape_cast %186 : vector<16x256xf32> to vector<2x8x256xf32>
    %c0_75 = arith.constant 0 : index
    %c0_76 = arith.constant 0 : index
    %c0_77 = arith.constant 0 : index
    %188 = vector.load %arg14[%c0_75, %c0_76, %c0_77] : memref<2x8x256xf32, #tpu.memory_space<vmem>>, vector<2x8x256xf32>
    tpu.vector_store %arg14[%c0_75, %c0_76, %c0_77], %187 {strides = array<i32>} : memref<2x8x256xf32, #tpu.memory_space<vmem>>, vector<2x8x256xf32>,
    return
  }
  func.func @transform_0(%arg0: i32) -> (i32, i32, i32) {
    %c0_i32 = arith.constant 0 : i32
    %c0_i32_0 = arith.constant 0 : i32
    %c0_i32_1 = arith.constant 0 : i32
    return %arg0, %c0_i32, %c0_i32_0 : i32, i32, i32
  }
  func.func @transform_1(%arg0: i32) -> (i32, i32, i32) {
    %c0_i32 = arith.constant 0 : i32
    %c0_i32_0 = arith.constant 0 : i32
    %c0_i32_1 = arith.constant 0 : i32
    return %arg0, %c0_i32, %c0_i32_0 : i32, i32, i32
  }
  func.func @transform_2(%arg0: i32) -> (i32, i32) {
    %c0_i32 = arith.constant 0 : i32
    %c0_i32_0 = arith.constant 0 : i32
    %c0_i32_1 = arith.constant 0 : i32
    return %c0_i32, %c0_i32_0 : i32, i32
  }
  func.func @transform_3(%arg0: i32) -> (i32, i32, i32) {
    %c0_i32 = arith.constant 0 : i32
    %c0_i32_0 = arith.constant 0 : i32
    %c0_i32_1 = arith.constant 0 : i32
    %c0_i32_2 = arith.constant 0 : i32
    return %c0_i32, %c0_i32_0, %c0_i32_1 : i32, i32, i32
  }
  func.func @transform_4(%arg0: i32) -> (i32, i32, i32) {
    %c0_i32 = arith.constant 0 : i32
    %c0_i32_0 = arith.constant 0 : i32
    %c0_i32_1 = arith.constant 0 : i32
    %c0_i32_2 = arith.constant 0 : i32
    return %c0_i32, %c0_i32_0, %c0_i32_1 : i32, i32, i32
  }
  func.func @transform_5(%arg0: i32) -> (i32, i32, i32) {
    %c0_i32 = arith.constant 0 : i32
    %c0_i32_0 = arith.constant 0 : i32
    %c0_i32_1 = arith.constant 0 : i32
    %c0_i32_2 = arith.constant 0 : i32
    return %c0_i32, %c0_i32_0, %c0_i32_1 : i32, i32, i32
  }
  func.func @transform_6(%arg0: i32) -> (i32, i32, i32) {
    %c0_i32 = arith.constant 0 : i32
    %c0_i32_0 = arith.constant 0 : i32
    %c0_i32_1 = arith.constant 0 : i32
    %c0_i32_2 = arith.constant 0 : i32
    return %c0_i32, %c0_i32_0, %c0_i32_1 : i32, i32, i32
  }
  func.func @transform_7(%arg0: i32) -> (i32, i32, i32) {
    %c0_i32 = arith.constant 0 : i32
    %c0_i32_0 = arith.constant 0 : i32
    %c0_i32_1 = arith.constant 0 : i32
    %c0_i32_2 = arith.constant 0 : i32
    return %c0_i32, %c0_i32_0, %c0_i32_1 : i32, i32, i32
  }
  func.func @transform_8(%arg0: i32) -> (i32, i32, i32) {
    %c0_i32 = arith.constant 0 : i32
    %c0_i32_0 = arith.constant 0 : i32
    %c0_i32_1 = arith.constant 0 : i32
    %c0_i32_2 = arith.constant 0 : i32
    return %c0_i32, %c0_i32_0, %c0_i32_1 : i32, i32, i32
  }
  func.func @transform_9(%arg0: i32) -> (i32, i32) {
    %c0_i32 = arith.constant 0 : i32
    %c0_i32_0 = arith.constant 0 : i32
    %c0_i32_1 = arith.constant 0 : i32
    return %c0_i32, %c0_i32_0 : i32, i32
  }
  func.func @transform_10(%arg0: i32) -> (i32, i32) {
    %c0_i32 = arith.constant 0 : i32
    %c0_i32_0 = arith.constant 0 : i32
    %c0_i32_1 = arith.constant 0 : i32
    return %c0_i32, %c0_i32_0 : i32, i32
  }
  func.func @transform_11(%arg0: i32) -> (i32, i32) {
    %c0_i32 = arith.constant 0 : i32
    %c0_i32_0 = arith.constant 0 : i32
    %c0_i32_1 = arith.constant 0 : i32
    return %c0_i32, %c0_i32_0 : i32, i32
  }
  func.func @transform_12(%arg0: i32) -> (i32, i32) {
    %c0_i32 = arith.constant 0 : i32
    %c0_i32_0 = arith.constant 0 : i32
    %c0_i32_1 = arith.constant 0 : i32
    return %c0_i32, %c0_i32_0 : i32, i32
  }
  func.func @transform_13(%arg0: i32) -> (i32, i32, i32) {
    %c0_i32 = arith.constant 0 : i32
    %c0_i32_0 = arith.constant 0 : i32
    %c0_i32_1 = arith.constant 0 : i32
    return %arg0, %c0_i32, %c0_i32_0 : i32, i32, i32
  }
}

</mosaic_0001>

<bundles_post_ra>
// kernel: tpu_custom_call.1
= control target key start
LH: loop header
LB: loop body
LE: loop exit
PB: predicated region body
PF: predicated region fallthrough
CT: control target
= control target key end

     0   :  { %18 = vsyncpa [#allocation3], 0  ;;  %s4996_s0 = inlined_call_operand.vmem [shape: s32[2,8,1], index: 0, kind: input, shape index: {}]   ;;  %s4997_s1 = inlined_call_operand.vmem [shape: f32[2,1,8], index: 1, kind: input, shape index: {}]   ;;  %s4998_s2 = inlined_call_operand.hbm [shape: f32[64,128], index: 2, kind: input, shape index: {}]   ;;  %s4999_s3 = inlined_call_operand.hbm [shape: bf16[2,128,384], index: 3, kind: input, shape index: {}]   ;;  %s5000_s4 = inlined_call_operand.vmem [shape: f32[2,1,384], index: 4, kind: input, shape index: {}]   ;;  %s5001_s5 = inlined_call_operand.hbm [shape: bf16[2,128,128], index: 5, kind: input, shape index: {}]   ;;  %s5002_s6 = inlined_call_operand.vmem [shape: f32[2,1,128], index: 6, kind: input, shape index: {}]   ;;  %s5003_s7 = inlined_call_operand.vmem [shape: f32[2,1,128], index: 7, kind: input, shape index: {}]   ;;  %s5004_s8 = inlined_call_operand.vmem [shape: f32[2,1,128], index: 8, kind: input, shape index: {}]   ;;  %s5005_s9 = inlined_call_operand.hbm [shape: bf16[128,256], index: 9, kind: input, shape index: {}]   ;;  %s5006_s10 = inlined_call_operand.vmem [shape: f32[1,256], index: 10, kind: input, shape index: {}]   ;;  %s5007_s11 = inlined_call_operand.hbm [shape: bf16[256,256], index: 11, kind: input, shape index: {}]   ;;  %s5008_s12 = inlined_call_operand.vmem [shape: f32[1,256], index: 12, kind: input, shape index: {}]   ;;  %s5009_s13 = inlined_call_operand.hbm [shape: f32[2,8,256], index: 13, kind: output, shape index: {}]  }
   0x1   :  { %19 = vsyncpa [#allocation6], 0 }
   0x2   :  { %20 = vsyncpa [#allocation9], 0 }
   0x3   :  { %21 = vsyncpa [#allocation4], 0  ;;  %s4334_s25 = smov [#allocation5]   ;;  %s4194_s29 = scalar_lea.hbm %s4999_s3, 6144 }
   0x4   :  { %s43_s26 = sshll.u32 %s4334_s25, 4  ;;  %p4195_p0 = scmp.ne.s32.totalorder %s4999_s3, %s4194_s29  ;;  %s44_s26 = int_to_ptr.vmem [resolvable:$true] %s43_s26 }
   0x5   :  { %p4198_p1 = scmp.lt.u32.totalorder %s4194_s29, %s4999_s3 }
   0x7   :  { %p4200_p2 = pnand %p4198_p1, %p4195_p0 }
   0x9   :  { %4203 = shalt.err (!%p4200_p2)
}
   0xa   :  { %s4204_s17 = scalar_lea.vmem %s44_s26, 6144  ;;  %p4209_p4 = scmp.lt.s32.totalorder %s44_s26, %s44_s26 }
   0xb   :  { %p4205_p3 = scmp.ne.s32.totalorder %s44_s26, %s4204_s17  ;;  %p4210_p5 = scmp.lt.s32.totalorder %s4204_s17, %s4204_s17 }
   0xd   :  { %p4211_p6 = por %p4210_p5, %p4209_p4 }
   0xf   :  { %p4212_p7 = pnand %p4211_p6, %p4205_p3 }
  0x11   :  { %4215 = shalt.err (!%p4212_p7)
}
  0x12   :  { %s4335_s18 = smov 192   ;;  %s4336_s19 = smov 12  }
  0x13   :  { %49 = dma.hbm_to_vmem [thread:$0]  %s4999_s3, 6144, %s44_s26, [#allocation6], %s4335_s18, %s4335_s18, %s4336_s19  }
  0x14   :  { %s4337_s22 = smov [#allocation8]   ;;  %s4338_s24 = smov [#allocation2]  }
  0x15   :  { %s75_s23 = sshll.u32 %s4337_s22, 4  ;;  %s31_s25 = sshll.u32 %s4338_s24, 4  ;;  %s76_s23 = int_to_ptr.vmem [resolvable:$true] %s75_s23  ;;  %s32_s25 = int_to_ptr.vmem [resolvable:$true] %s31_s25 }
  0x16   :  { %s4216_s29 = scalar_lea.hbm %s5005_s9, 2048 }
  0x17   :  { %p4217_p8 = scmp.ne.s32.totalorder %s5005_s9, %s4216_s29  ;;  %p4220_p9 = scmp.lt.u32.totalorder %s4216_s29, %s5005_s9 }
  0x19   :  { %p4222_p10 = pnand %p4220_p9, %p4217_p8 }
  0x1b   :  { %4225 = shalt.err (!%p4222_p10)
}
  0x1c   :  { %s4226_s3 = scalar_lea.vmem %s76_s23, 2048  ;;  %p4231_p12 = scmp.lt.s32.totalorder %s76_s23, %s76_s23 }
  0x1d   :  { %p4227_p11 = scmp.ne.s32.totalorder %s76_s23, %s4226_s3  ;;  %p4232_p13 = scmp.lt.s32.totalorder %s4226_s3, %s4226_s3 }
  0x1f   :  { %p4233_p0 = por %p4232_p13, %p4231_p12 }
  0x21   :  { %p4234_p1 = pnand %p4233_p0, %p4227_p11 }
  0x23   :  { %4237 = shalt.err (!%p4234_p1)
}
  0x24   :  { %s4339_s26 = smov 128   ;;  %s4340_s17 = smov 8  }
  0x25   :  { %81 = dma.hbm_to_vmem [thread:$0]  %s5005_s9, 2048, %s76_s23, [#allocation9], %s4339_s26, %s4339_s26, %s4340_s17  }
  0x26   :  { %s4238_s22 = scalar_lea.hbm %s4998_s2, 1024 }
  0x27   :  { %p4239_p2 = scmp.ne.s32.totalorder %s4998_s2, %s4238_s22  ;;  %p4242_p3 = scmp.lt.u32.totalorder %s4238_s22, %s4998_s2 }
  0x29   :  { %p4244_p4 = pnand %p4242_p3, %p4239_p2 }
  0x2b   :  { %4247 = shalt.err (!%p4244_p4)
}
  0x2c   :  { %s4248_s30 = scalar_lea.vmem %s32_s25, 1024  ;;  %p4253_p6 = scmp.lt.s32.totalorder %s32_s25, %s32_s25 }
  0x2d   :  { %p4249_p5 = scmp.ne.s32.totalorder %s32_s25, %s4248_s30  ;;  %p4254_p7 = scmp.lt.s32.totalorder %s4248_s30, %s4248_s30 }
  0x2f   :  { %p4255_p8 = por %p4254_p7, %p4253_p6 }
  0x31   :  { %p4256_p9 = pnand %p4255_p8, %p4249_p5 }
  0x33   :  { %4259 = shalt.err (!%p4256_p9)
}
  0x34   :  { %37 = dma.hbm_to_vmem [thread:$0]  %s4998_s2, 1024, %s32_s25, [#allocation3], %s4339_s26, %s4339_s26, %s4340_s17  }
  0x35   :  { %s4341_s14 = smov [#allocation7]   ;;  %s4260_s18 = scalar_lea.hbm %s5001_s5, 2048 }
  0x36   :  { %s57_s15 = sshll.u32 %s4341_s14, 4  ;;  %p4261_p10 = scmp.ne.s32.totalorder %s5001_s5, %s4260_s18  ;;  %s58_s15 = int_to_ptr.vmem [resolvable:$true] %s57_s15 }
  0x37   :  { %p4264_p11 = scmp.lt.u32.totalorder %s4260_s18, %s5001_s5 }
  0x39   :  { %p4266_p12 = pnand %p4264_p11, %p4261_p10 }
  0x3b   :  { %4269 = shalt.err (!%p4266_p12)
}
  0x3c   :  { %s4270_s24 = scalar_lea.vmem %s58_s15, 2048  ;;  %p4275_p0 = scmp.lt.s32.totalorder %s58_s15, %s58_s15 }
  0x3d   :  { %p4271_p13 = scmp.ne.s32.totalorder %s58_s15, %s4270_s24  ;;  %p4276_p1 = scmp.lt.s32.totalorder %s4270_s24, %s4270_s24 }
  0x3f   :  { %p4277_p2 = por %p4276_p1, %p4275_p0 }
  0x41   :  { %p4278_p3 = pnand %p4277_p2, %p4271_p13 }
  0x43   :  { %4281 = shalt.err (!%p4278_p3)
}
  0x44   :  { %s4342_s2 = smov 64   ;;  %s4343_s25 = smov 4  }
  0x45   :  { %63 = dma.hbm_to_vmem [thread:$0]  %s5001_s5, 2048, %s58_s15, [#allocation6], %s4342_s2, %s4342_s2, %s4343_s25  }
  0x46   :  { %s4344_s29 = smov [#allocation10]   ;;  %s4282_s14 = scalar_lea.hbm %s5007_s11, 4096 }
  0x47   :  { %s89_s30 = sshll.u32 %s4344_s29, 4  ;;  %p4283_p4 = scmp.ne.s32.totalorder %s5007_s11, %s4282_s14  ;;  %s90_s30 = int_to_ptr.vmem [resolvable:$true] %s89_s30 }
  0x48   :  { %p4286_p5 = scmp.lt.u32.totalorder %s4282_s14, %s5007_s11 }
  0x4a   :  { %p4288_p6 = pnand %p4286_p5, %p4283_p4 }
  0x4c   :  { %4291 = shalt.err (!%p4288_p6)
}
  0x4d   :  { %s4292_s20 = scalar_lea.vmem %s90_s30, 4096  ;;  %p4297_p8 = scmp.lt.s32.totalorder %s90_s30, %s90_s30 }
  0x4e   :  { %p4293_p7 = scmp.ne.s32.totalorder %s90_s30, %s4292_s20  ;;  %p4298_p9 = scmp.lt.s32.totalorder %s4292_s20, %s4292_s20 }
  0x50   :  { %p4299_p10 = por %p4298_p9, %p4297_p8 }
  0x52   :  { %p4300_p11 = pnand %p4299_p10, %p4293_p7 }
  0x54   :  { %4303 = shalt.err (!%p4300_p11)
}
  0x55   :  { %95 = dma.hbm_to_vmem [thread:$0]  %s5007_s11, 4096, %s90_s30, [#allocation9], %s4339_s26, %s4339_s26, %s4340_s17  }
  0x56   :  { %4326 = dma.done.wait [#allocation3], 1024  }
  0x57   :  { %4327 = vsyncadd [#allocation3], 4294966272 }
  0x58   :  { %4328 = dma.done.wait [#allocation6], 8192  }
  0x59   :  { %4329 = vsyncadd [#allocation6], 4294959104 }
  0x5a   :  { %4330 = dma.done.wait [#allocation9], 6144  }
  0x5b   :  { %4331 = vsyncadd [#allocation9], 4294961152  ;;  %v4345_v0 = vmov 0   ;;  %v114_v1 = vld [vmem:[%s4996_s0] sm:$0xff]  ;;  %v131_v3 = vld [vmem:[#allocation2 + $0x8] sm:$0xff]  ;;  %v4346_v24 = vmov 0.0   ;;  %v116_v31 = vlaneseq }
  0x5c   :  { %3939 = vset.pattern.permute.xlu0 %v4345_v0  ;;  %432 = vmatprep.mubr.bf16.mxu1 %v4345_v0  ;;  %v130_v2 = vld [vmem:[#allocation2] sm:$0xff]  ;;  %v132_v4 = vld [vmem:[#allocation2 + $0x10] sm:$0xff]  ;;  %v133_v5 = vld [vmem:[#allocation2 + $0x18] sm:$0xff]  ;;  %vm138_vm0 = vcmask 523264   ;;  %vm4347_vm3 = vmmov 0   ;;  %vm544_vm4 = vcmask 261120  }
  0x5d   :  { %119 = vperm.xlu0 %3939, %v114_v1   ;;  %v115_v6 = vld [vmem:[%s4996_s0 + $0x8] sm:$0xff]  ;;  %v3904_v7 = vpack.c.bf16 %v131_v3, %v130_v2  ;;  %v3908_v8 = vpack.c.bf16 %v133_v5, %v132_v4  ;;  %v134_v9 = vld [vmem:[#allocation2 + $0x20] sm:$0xff]  ;;  %v136_v11 = vld [vmem:[#allocation2 + $0x30] sm:$0xff]  ;;  %v117_v32 = vand.u32 127, %v116_v31  ;;  %v4528_v49 = vshrl.u32 %v116_v31, 7  ;;  %s4348_s24 = smov 96  }
  0x5e   :  { %v135_v10 = vld [vmem:[#allocation2 + $0x28] sm:$0xff]  ;;  %v137_v12 = vld [vmem:[#allocation2 + $0x38] sm:$0xff]  ;;  %v3970_v14 = vld [vmem:[#allocation5 + $0x4] ss:$12 sps:$4 sm:$0xff]   ;;  %s4349_s25 = smov 32   ;;  %vm1013_vm5 = vcmask 1043456  }
  0x5f   :  { %3905 = vmatprep.subr.bf16.mxu0 %v3904_v7  ;;  %v3912_v13 = vpack.c.bf16 %v135_v10, %v134_v9  ;;  %v3972_v15 = vld [vmem:[#allocation5] ss:$12 sps:$4 sm:$0xff]   ;;  %v3973_v16 = vld [vmem:[#allocation5 + $0x1c] ss:$12 sps:$4 sm:$0xff]   ;;  %400 = vmatprep.subr.bf16.mxu1 %v3970_v14  ;;  %v3916_v17 = vpack.c.bf16 %v137_v12, %v136_v11  ;;  %v3975_v18 = vld [vmem:[#allocation5 + $0x18] ss:$12 sps:$4 sm:$0xff]  }
  0x60   :  { %3907 = vmatpush3.bf16.msra.mxu0 %v3904_v7  ;;  %401 = vmatpush1.bf16.msra.mxu1 %v3972_v15  ;;  %v3976_v19 = vld [vmem:[#allocation5 + $0x34] ss:$12 sps:$4 sm:$0xff]   ;;  %v3978_v20 = vld [vmem:[#allocation5 + $0x30] ss:$12 sps:$4 sm:$0xff]   ;;  %v3979_v21 = vld [vmem:[#allocation5 + $0x4c] ss:$12 sps:$4 sm:$0xff]  }
  0x61   :  { %122 = vperm.xlu0 %3939, %v115_v6   ;;  %3909 = vmatprep.subr.bf16.mxu0 %v3908_v8  ;;  %v3981_v22 = vld [vmem:[#allocation5 + $0x48] ss:$12 sps:$4 sm:$0xff]   ;;  %v3982_v23 = vld [vmem:[#allocation5 + $0x64] ss:$12 sps:$4 sm:$0xff]   ;;  %v3984_v25 = vld [vmem:[#allocation5 + $0x60] ss:$12 sps:$4 sm:$0xff]  }
  0x62   :  { %402 = vmatprep.subr.bf16.mxu1 %v3973_v16  ;;  %v3985_v26 = vld [vmem:[#allocation5 + $0x7c] ss:$12 sps:$4 sm:$0xff]   ;;  %v3987_v27 = vld [vmem:[#allocation5 + $0x78] ss:$12 sps:$4 sm:$0xff]   ;;  %v3988_v28 = vld [vmem:[#allocation5 + $0x94] ss:$12 sps:$4 sm:$0xff]  }
  0x63   :  { %v3990_v29 = vld [vmem:[#allocation5 + $0x90] ss:$12 sps:$4 sm:$0xff]   ;;  %v3991_v30 = vld [vmem:[#allocation5 + $0xac] ss:$12 sps:$4 sm:$0xff]   ;;  %v3993_v37 = vld [vmem:[#allocation5 + $0xa8] ss:$12 sps:$4 sm:$0xff]  }
  0x64   :  { %3911 = vmatpush3.bf16.msra.mxu0 %v3908_v8  ;;  %403 = vmatpush1.bf16.msra.mxu1 %v3975_v18  ;;  %v3994_v40 = vld [vmem:[#allocation5 + $0x8] ss:$12 sps:$4 sm:$0xff]   ;;  %v3995_v42 = vld [vmem:[#allocation5 + $0x20] ss:$12 sps:$4 sm:$0xff]   ;;  %v3996_v43 = vld [vmem:[#allocation5 + $0x38] ss:$12 sps:$4 sm:$0xff]  }
  0x65   :  { %3913 = vmatprep.subr.bf16.mxu0 %v3912_v13  ;;  %404 = vmatprep.subr.bf16.mxu1 %v3976_v19  ;;  %v3997_v44 = vld [vmem:[#allocation5 + $0x50] ss:$12 sps:$4 sm:$0xff]   ;;  %v3998_v45 = vld [vmem:[#allocation5 + $0x68] ss:$12 sps:$4 sm:$0xff]   ;;  %v3999_v46 = vld [vmem:[#allocation5 + $0x80] ss:$12 sps:$4 sm:$0xff]  }
  0x66   :  { %v4000_v47 = vld [vmem:[#allocation5 + $0x98] ss:$12 sps:$4 sm:$0xff]   ;;  %v4001_v48 = vld [vmem:[#allocation5 + $0xb0] ss:$12 sps:$4 sm:$0xff]   ;;  %v4531_v50 = vsub.s32 0, %v4528_v49  ;;  %v4537_v52 = vsub.s32 1, %v4528_v49 }
  0x67   :  { %v255_v51 = vld [vmem:[%s5000_s4] sm:$0x7]  ;;  %v267_v19 = vsub.s32 2, %v4528_v49  ;;  %vm913_vm6 = vcmask 64512   ;;  %vm1407_vm7 = vcmask 785408   ;;  %s4350_s22 = smov [#allocation11]  }
  0x68   :  { %3915 = vmatpush3.bf16.msra.mxu0 %v3912_v13  ;;  %405 = vmatpush1.bf16.msra.mxu1 %v3978_v20  ;;  %v260_v53 = vrot.slane %v255_v51, %v4531_v50  ;;  %v264_v54 = vrot.slane %v255_v51, %v4537_v52  ;;  %s3313_s11 = sshll.u32 %s4350_s22, 4  ;;  %s3314_s11 = int_to_ptr.vmem [resolvable:$true] %s3313_s11 }
  0x69   :  { %3917 = vmatprep.subr.bf16.mxu0 %v3916_v17  ;;  %406 = vmatprep.subr.bf16.mxu1 %v3979_v21  ;;  %p4309_p13 = scmp.lt.s32.totalorder %s3314_s11, %s3314_s11 }
  0x6c   :  { %3919 = vmatpush3.bf16.msra.mxu0 %v3916_v17  ;;  %407 = vmatpush1.bf16.msra.mxu1 %v3981_v22 }
  0x6d   :  { %3664 = vmatprep.subr.bf16.mxu0 %v4346_v24  ;;  %408 = vmatprep.subr.bf16.mxu1 %v3982_v23  ;;  %v268_v23 = vrot.slane %v255_v51, %v267_v19 }
  0x70   :  { %409 = vmatpush1.bf16.msra.mxu1 %v3984_v25 }
  0x71   :  { %410 = vmatprep.subr.bf16.mxu1 %v3985_v26 }
  0x74   :  { %411 = vmatpush1.bf16.msra.mxu1 %v3987_v27 }
  0x75   :  { %412 = vmatprep.subr.bf16.mxu1 %v3988_v28 }
  0x78   :  { %413 = vmatpush1.bf16.msra.mxu1 %v3990_v29 }
  0x79   :  { %414 = vmatprep.subr.bf16.mxu1 %v3991_v30 }
  0x7c   :  { %415 = vmatpush1.bf16.msra.mxu1 %v3993_v37  ;;  %v4603_v37 = vld [vmem:[%s4997_s1] ss:$0 sm:$0xff] }
  0x7d   :  { %3632 = vmatprep.subr.bf16.mxu1 %v4346_v24 }
  0xdc   :  { %v120_v33 = vpop.permute.xlu0 %119 }
  0xdd   :  { %vm124_vm1 = vcmp.eq.s32.totalorder %v120_v33, %v117_v32 }
  0xde   :  { %v3327_v34 = vsel %vm124_vm1, 1.0, %v4346_v24 }
  0xdf   :  { %3629 = vmatprep.mubr.msk.f32.mxu0 %vm138_vm0, %v3327_v34 }
  0xe0   :  { %v123_v35 = vpop.permute.xlu0 %122 }
  0xe1   :  { %vm125_vm2 = vcmp.eq.s32.totalorder %v123_v35, %v117_v32 }
  0xe2   :  { %v3328_v36 = vsel %vm125_vm2, 1.0, %v4346_v24 }
  0xe3   :  { %3630 = vmatmul.mubr.msk.f32.vlgmr.msra.gmra.mrb[0].mxu0 %vm138_vm0, %v3328_v36 }
  0xe4   :  { %3666 = vmatprep.mubr.msk.bf16.mxu0 %vm4347_vm3, %v4346_v24 }
 0x1b6   :  { %v4510_v38 = vpop.f32.mrb[0].mxu0 }
 0x1b7   :  { %v4512_v39 = vpop.f32.mrb[1].mxu0 }
 0x1b8   :  { %v222_v41 = vpack.c.bf16 %v4510_v38, %v4512_v39 }
 0x1ba   :  { %433 = vmatmul.mubr.bf16.vlgmr.msra.gmra.mrb[0].mxu1 %v222_v41 }
 0x1bb   :  { %3633 = vmatpush3.bf16.msra.mxu1 %v3994_v40  ;;  %3648 = vmatprep.mubr.msk.bf16.mxu1 %vm4347_vm3, %v4346_v24 }
 0x1bc   :  { %3634 = vmatprep.subr.bf16.mxu1 %v4346_v24 }
 0x1bf   :  { %3635 = vmatpush3.bf16.msra.mxu1 %v3995_v42 }
 0x1c0   :  { %3636 = vmatprep.subr.bf16.mxu1 %v4346_v24 }
 0x1c3   :  { %3637 = vmatpush3.bf16.msra.mxu1 %v3996_v43 }
 0x1c4   :  { %3638 = vmatprep.subr.bf16.mxu1 %v4346_v24 }
 0x1c7   :  { %3639 = vmatpush3.bf16.msra.mxu1 %v3997_v44 }
 0x1c8   :  { %3640 = vmatprep.subr.bf16.mxu1 %v4346_v24 }
 0x1cb   :  { %3641 = vmatpush3.bf16.msra.mxu1 %v3998_v45 }
 0x1cc   :  { %3642 = vmatprep.subr.bf16.mxu1 %v4346_v24 }
 0x1cf   :  { %3643 = vmatpush3.bf16.msra.mxu1 %v3999_v46  ;;  %v4613_v46 = vld [vmem:[%s4997_s1 + $0x1] ss:$0 sm:$0xff] }
 0x1d0   :  { %3644 = vmatprep.subr.bf16.mxu1 %v4346_v24 }
 0x1d3   :  { %3645 = vmatpush3.bf16.msra.mxu1 %v4000_v47 }
 0x1d4   :  { %3646 = vmatprep.subr.bf16.mxu1 %v4346_v24 }
 0x1d7   :  { %3647 = vmatpush3.bf16.msra.mxu1 %v4001_v48 }
 0x1d8   :  { %3652 = vmatprep.subr.bf16.mxu1 %v4346_v24 }
 0x1da   :  { %3649 = vmatmul.mubr.bf16.vlgmr.msra.gmra.mrb[4].mxu1 %v222_v41 }
 0x1db   :  { %3654 = vmatprep.mubr.msk.bf16.mxu1 %vm4347_vm3, %v4346_v24 }
 0x28d   :  { %v434_v55 = vpop.f32.mrb[0].mxu1 }
 0x28e   :  { %v435_v56 = vadd.f32 %v434_v55, %v260_v53  ;;  %v436_v57 = vpop.f32.mrb[1].mxu1 }
 0x28f   :  { %v437_v58 = vadd.f32 %v436_v57, %v264_v54  ;;  %v438_v59 = vpop.f32.mrb[2].mxu1 }
 0x290   :  { %v439_v60 = vadd.f32 %v438_v59, %v260_v53  ;;  %v440_v61 = vpop.f32.mrb[3].mxu1 }
 0x291   :  { %v3495_v62 = vpack.c.bf16 %v437_v58, %v435_v56  ;;  %v441_v63 = vadd.f32 %v440_v61, %v264_v54 }
 0x293   :  { %v3497_v1 = vpack.c.bf16 %v441_v63, %v439_v60  ;;  %504 = vrot.lane.b32.xlu0 %v3495_v62, %s4342_s2  ;;  %500 = vrot.lane.b32.xlu1 %v3495_v62, %s4348_s24  ;;  %v512_v2 = vrot.slane %v3495_v62, 4 }
 0x295   :  { %v549_v3 = vsel %vm544_vm4, %v512_v2, 0  ;;  %v513_v4 = vrot.slane %v3497_v1, 4 }
 0x296   :  { %3653 = vmatpush3.bf16.xpose.msra.mxu1 %v549_v3 }
 0x297   :  { %508 = vrot.lane.b32.xlu0 %v3495_v62, %s4349_s25  ;;  %502 = vrot.lane.b32.xlu1 %v3497_v1, %s4348_s24  ;;  %v595_v5 = vsel %vm544_vm4, %v513_v4, 0 }
 0x298   :  { %3658 = vmatprep.subr.bf16.mxu1 %v4346_v24 }
 0x29b   :  { %506 = vrot.lane.b32.xlu1 %v3497_v1, %s4342_s2 }
 0x29d   :  { %3655 = vmatmul.mubr.msk.bf16.vlgmr.msra.gmra.mrb[8].mxu1 %vm544_vm4, %v3495_v62 }
 0x29e   :  { %3659 = vmatpush3.bf16.xpose.msra.mxu1 %v595_v5  ;;  %3660 = vmatprep.mubr.msk.bf16.mxu1 %vm4347_vm3, %v4346_v24 }
 0x29f   :  { %510 = vrot.lane.b32.xlu1 %v3497_v1, %s4349_s25  ;;  %3670 = vmatprep.subr.bf16.mxu1 %v4346_v24 }
 0x2a5   :  { %3661 = vmatmul.mubr.msk.bf16.vlgmr.msra.gmra.mrb[12].mxu1 %vm544_vm4, %v3497_v1 }
 0x2a6   :  { %3672 = vmatprep.mubr.msk.bf16.mxu1 %vm4347_vm3, %v4346_v24 }
 0x2ad   :  { %v477_v6 = vpop.f32.mrb[4].mxu1 }
 0x2ae   :  { %v3650_v7 = vpop.f32.mrb[5].mxu1  ;;  %v478_v28 = vadd.f32 %v477_v6, %v268_v23 }
 0x2af   :  { %v480_v8 = vpop.f32.mrb[6].mxu1 }
 0x2b0   :  { %v3651_v9 = vpop.f32.mrb[7].mxu1  ;;  %v4579_v31 = vpack.c.bf16 %v478_v28, %v478_v28  ;;  %v481_v32 = vadd.f32 %v480_v8, %v268_v23 }
 0x2b2   :  { %v4586_v34 = vpack.c.bf16 %v481_v32, %v481_v32  ;;  %v1015_v35 = vsel %vm1013_vm5, %v4579_v31, 0 }
 0x2b4   :  { %v1061_v36 = vsel %vm1013_vm5, %v4586_v34, 0 }
 0x305   :  { %v501_v10 = vpop.permute.xlu1 %500  ;;  %v505_v13 = vpop.permute.xlu0 %504 }
 0x306   :  { %v514_v11 = vrot.slane %v501_v10, 4  ;;  %v516_v16 = vrot.slane %v505_v13, 4 }
 0x308   :  { %v641_v12 = vsel %vm544_vm4, %v514_v11, 0  ;;  %v733_v21 = vsel %vm544_vm4, %v516_v16, 0 }
 0x309   :  { %3665 = vmatpush3.bf16.xpose.msra.mxu0 %v641_v12  ;;  %v503_v14 = vpop.permute.xlu1 %502  ;;  %v509_v22 = vpop.permute.xlu0 %508 }
 0x30a   :  { %v515_v15 = vrot.slane %v503_v14, 4  ;;  %3676 = vmatprep.subr.bf16.mxu0 %v4346_v24  ;;  %v518_v25 = vrot.slane %v509_v22, 4 }
 0x30c   :  { %v687_v17 = vsel %vm544_vm4, %v515_v15, 0  ;;  %v825_v30 = vsel %vm544_vm4, %v518_v25, 0 }
 0x30d   :  { %v507_v18 = vpop.permute.xlu1 %506  ;;  %3671 = vmatpush3.bf16.xpose.msra.mxu1 %v687_v17 }
 0x30e   :  { %3682 = vmatprep.subr.bf16.mxu1 %v4346_v24  ;;  %v517_v20 = vrot.slane %v507_v18, 4 }
 0x310   :  { %3667 = vmatmul.mubr.msk.bf16.vlgmr.msra.gmra.mrb[4].mxu0 %vm544_vm4, %v501_v10  ;;  %v779_v26 = vsel %vm544_vm4, %v517_v20, 0 }
 0x311   :  { %3677 = vmatpush3.bf16.xpose.msra.mxu0 %v733_v21  ;;  %3678 = vmatprep.mubr.msk.bf16.mxu0 %vm4347_vm3, %v4346_v24  ;;  %v511_v27 = vpop.permute.xlu1 %510 }
 0x312   :  { %3688 = vmatprep.subr.bf16.mxu0 %v4346_v24  ;;  %v519_v29 = vrot.slane %v511_v27, 4 }
 0x314   :  { %3673 = vmatmul.mubr.msk.bf16.vlgmr.msra.gmra.mrb[16].mxu1 %vm544_vm4, %v503_v14  ;;  %v871_v33 = vsel %vm544_vm4, %v519_v29, 0 }
 0x315   :  { %3683 = vmatpush3.bf16.xpose.msra.mxu1 %v779_v26  ;;  %3684 = vmatprep.mubr.msk.bf16.mxu1 %vm4347_vm3, %v4346_v24 }
 0x316   :  { %3694 = vmatprep.subr.bf16.mxu1 %v4346_v24 }
 0x318   :  { %3679 = vmatmul.mubr.msk.bf16.vlgmr.msra.gmra.mrb[8].mxu0 %vm544_vm4, %v505_v13 }
 0x319   :  { %3689 = vmatpush3.bf16.xpose.msra.mxu0 %v825_v30  ;;  %3690 = vmatprep.mubr.msk.bf16.mxu0 %vm4347_vm3, %v4346_v24 }
 0x31a   :  { %3700 = vmatprep.subr.bf16.mxu0 %v4346_v24 }
 0x31c   :  { %3685 = vmatmul.mubr.msk.bf16.vlgmr.msra.gmra.mrb[20].mxu1 %vm544_vm4, %v507_v18 }
 0x31d   :  { %3695 = vmatpush3.bf16.xpose.msra.mxu1 %v871_v33  ;;  %3696 = vmatprep.mubr.msk.bf16.mxu1 %vm4347_vm3, %v4346_v24 }
 0x31e   :  { %3706 = vmatprep.subr.bf16.mxu1 %v4346_v24 }
 0x320   :  { %3691 = vmatmul.mubr.msk.bf16.vlgmr.msra.gmra.mrb[12].mxu0 %vm544_vm4, %v509_v22 }
 0x321   :  { %3701 = vmatpush3.bf16.msra.mxu0 %v1015_v35  ;;  %3702 = vmatprep.mubr.msk.bf16.mxu0 %vm4347_vm3, %v4346_v24 }
 0x322   :  { %3712 = vmatprep.subr.bf16.mxu0 %v4346_v24 }
 0x324   :  { %3697 = vmatmul.mubr.msk.bf16.vlgmr.msra.gmra.mrb[24].mxu1 %vm544_vm4, %v511_v27 }
 0x325   :  { %3707 = vmatpush3.bf16.msra.mxu1 %v1061_v36  ;;  %3708 = vmatprep.mubr.msk.bf16.mxu1 %vm4347_vm3, %v4346_v24 }
 0x326   :  { %3718 = vmatprep.subr.bf16.mxu1 %v4346_v24 }
 0x370   :  { %v585_v40 = vpop.f32.mrb[8].mxu1 }
 0x371   :  { %v4606_v41 = vadd.f32 %v4603_v37, %v585_v40  ;;  %v3656_v42 = vpop.f32.mrb[9].mxu1 }
 0x372   :  { %v588_v43 = vpop.f32.mrb[10].mxu1 }
 0x373   :  { %v3657_v44 = vpop.f32.mrb[11].mxu1  ;;  %v914_v45 = vsel %vm913_vm6, %v4606_v41, -inf }
 0x374   :  { %915 = vmax.xlane.f32.xlu0 %v914_v45 }
 0x378   :  { %v631_v47 = vpop.f32.mrb[12].mxu1 }
 0x379   :  { %v632_v48 = vadd.f32 %v4613_v46, %v631_v47  ;;  %v3662_v51 = vpop.f32.mrb[13].mxu1 }
 0x37a   :  { %v634_v53 = vpop.f32.mrb[14].mxu1 }
 0x37b   :  { %v3663_v54 = vpop.f32.mrb[15].mxu1  ;;  %v917_v55 = vsel %vm913_vm6, %v632_v48, -inf }
 0x37c   :  { %918 = vmax.xlane.f32.xlu1 %v917_v55 }
 0x3e3   :  { %v677_v56 = vpop.f32.mrb[4].mxu0 }
 0x3e4   :  { %v678_v57 = vadd.f32 %v4603_v37, %v677_v56  ;;  %v3668_v58 = vpop.f32.mrb[5].mxu0 }
 0x3e5   :  { %v680_v59 = vpop.f32.mrb[6].mxu0 }
 0x3e6   :  { %v3669_v60 = vpop.f32.mrb[7].mxu0  ;;  %v920_v61 = vsel %vm913_vm6, %v678_v57, -inf }
 0x3e7   :  { %921 = vmax.xlane.f32.xlu0 %v920_v61  ;;  %v723_v62 = vpop.f32.mrb[16].mxu1 }
 0x3e8   :  { %v724_v63 = vadd.f32 %v4613_v46, %v723_v62  ;;  %v3674_v1 = vpop.f32.mrb[17].mxu1 }
 0x3e9   :  { %v726_v2 = vpop.f32.mrb[18].mxu1 }
 0x3ea   :  { %v3675_v3 = vpop.f32.mrb[19].mxu1  ;;  %v923_v4 = vsel %vm913_vm6, %v724_v63, -inf }
 0x3eb   :  { %v769_v5 = vpop.f32.mrb[8].mxu0  ;;  %924 = vmax.xlane.f32.xlu0 %v923_v4 }
 0x3ec   :  { %v4622_v6 = vadd.f32 %v4603_v37, %v769_v5  ;;  %v3680_v7 = vpop.f32.mrb[9].mxu0 }
 0x3ed   :  { %v772_v8 = vpop.f32.mrb[10].mxu0 }
 0x3ee   :  { %v3681_v9 = vpop.f32.mrb[11].mxu0  ;;  %v926_v10 = vsel %vm913_vm6, %v4622_v6, -inf }
 0x3ef   :  { %927 = vmax.xlane.f32.xlu1 %v926_v10  ;;  %v815_v11 = vpop.f32.mrb[20].mxu1 }
 0x3f0   :  { %v816_v12 = vadd.f32 %v4613_v46, %v815_v11  ;;  %v3686_v13 = vpop.f32.mrb[21].mxu1 }
 0x3f1   :  { %v818_v14 = vpop.f32.mrb[22].mxu1 }
 0x3f2   :  { %v3687_v15 = vpop.f32.mrb[23].mxu1  ;;  %v929_v16 = vsel %vm913_vm6, %v816_v12, -inf }
 0x3f3   :  { %v861_v17 = vpop.f32.mrb[12].mxu0  ;;  %930 = vmax.xlane.f32.xlu0 %v929_v16 }
 0x3f4   :  { %v862_v18 = vadd.f32 %v4603_v37, %v861_v17  ;;  %v3692_v20 = vpop.f32.mrb[13].mxu0 }
 0x3f5   :  { %v864_v21 = vpop.f32.mrb[14].mxu0 }
 0x3f6   :  { %v3693_v22 = vpop.f32.mrb[15].mxu0  ;;  %v932_v23 = vsel %vm913_vm6, %v862_v18, -inf }
 0x3f7   :  { %933 = vmax.xlane.f32.xlu1 %v932_v23  ;;  %v907_v25 = vpop.f32.mrb[24].mxu1 }
 0x3f8   :  { %v908_v26 = vadd.f32 %v4613_v46, %v907_v25  ;;  %v3698_v27 = vpop.f32.mrb[25].mxu1 }
 0x3f9   :  { %v910_v28 = vpop.f32.mrb[26].mxu1 }
 0x3fa   :  { %v3699_v29 = vpop.f32.mrb[27].mxu1  ;;  %v935_v30 = vsel %vm913_vm6, %v908_v26, -inf }
 0x3fb   :  { %936 = vmax.xlane.f32.xlu0 %v935_v30 }
 0x401   :  { %v916_v36 = vpop.xlane.xlu0 %915 }
 0x402   :  { %v938_v40 = vsub.f32 %v4606_v41, %v916_v36 }
 0x404   :  { %v946_v44 = vmul.f32 1.442695, %v938_v40 }
 0x408   :  { %520 = vrot.lane.b32.xlu1 %v4579_v31, %s4348_s24 }
 0x409   :  { %v919_v32 = vpop.xlane.xlu1 %918 }
 0x40a   :  { %v939_v33 = vsub.f32 %v632_v48, %v919_v32 }
 0x40c   :  { %v948_v35 = vmul.f32 1.442695, %v939_v33 }
 0x40e   :  { %4122 = vpow2.f32 %v948_v35 }
 0x40f   :  { %4124 = vpow2.f32 %v946_v44 }
 0x418   :  { %v4123_v42 = vpop.eup %4122 }
 0x419   :  { %v965_v43 = vsel %vm913_vm6, %v4123_v42, 0.0  ;;  %v4125_v45 = vpop.eup %4124 }
 0x41a   :  { %966 = vadd.xlane.f32.xlu0 %v965_v43  ;;  %v962_v47 = vsel %vm913_vm6, %v4125_v45, 0.0 }
 0x42c   :  { %963 = vadd.xlane.f32.xlu1 %v962_v47 }
 0x474   :  { %v922_v51 = vpop.xlane.xlu0 %921 }
 0x475   :  { %v940_v53 = vsub.f32 %v678_v57, %v922_v51 }
 0x477   :  { %v950_v54 = vmul.f32 1.442695, %v940_v53 }
 0x478   :  { %v925_v55 = vpop.xlane.xlu0 %924 }
 0x479   :  { %4126 = vpow2.f32 %v950_v54  ;;  %v941_v48 = vsub.f32 %v724_v63, %v925_v55 }
 0x47b   :  { %v952_v56 = vmul.f32 1.442695, %v941_v48 }
 0x47c   :  { %v928_v62 = vpop.xlane.xlu1 %927 }
 0x47d   :  { %4128 = vpow2.f32 %v952_v56  ;;  %v942_v63 = vsub.f32 %v4622_v6, %v928_v62 }
 0x47f   :  { %v954_v4 = vmul.f32 1.442695, %v942_v63 }
 0x480   :  { %v931_v57 = vpop.xlane.xlu0 %930 }
 0x481   :  { %v943_v2 = vsub.f32 %v816_v12, %v931_v57 }
 0x483   :  { %v4637_v58 = vpop.eup %4126  ;;  %v956_v7 = vmul.f32 1.442695, %v943_v2 }
 0x484   :  { %v968_v41 = vsel %vm913_vm6, %v4637_v58, 0.0  ;;  %v934_v3 = vpop.xlane.xlu1 %933 }
 0x485   :  { %969 = vadd.xlane.f32.xlu1 %v968_v41  ;;  %v944_v5 = vsub.f32 %v862_v18, %v934_v3 }
 0x487   :  { %v4641_v59 = vpop.eup %4128  ;;  %v958_v9 = vmul.f32 1.442695, %v944_v5 }
 0x488   :  { %v971_v60 = vsel %vm913_vm6, %v4641_v59, 0.0  ;;  %v937_v61 = vpop.xlane.xlu0 %936  ;;  %v521_v14 = vpop.permute.xlu1 %520 }
 0x489   :  { %972 = vadd.xlane.f32.xlu0 %v971_v60  ;;  %v945_v8 = vsub.f32 %v908_v26, %v937_v61  ;;  %v1107_v28 = vsel %vm1013_vm5, %v521_v14, 0 }
 0x48b   :  { %v960_v10 = vmul.f32 1.442695, %v945_v8 }
 0x496   :  { %524 = vrot.lane.b32.xlu1 %v4579_v31, %s4342_s2 }
 0x49a   :  { %526 = vrot.lane.b32.xlu1 %v4586_v34, %s4342_s2 }
 0x49f   :  { %522 = vrot.lane.b32.xlu0 %v4586_v34, %s4348_s24 }
 0x4a7   :  { %v967_v1 = vpop.xlane.xlu0 %966 }
 0x4a8   :  { %4130 = vrcp.f32 %v967_v1 }
 0x4a9   :  { %4132 = vpow2.f32 %v954_v4 }
 0x4aa   :  { %4134 = vpow2.f32 %v956_v7 }
 0x4ab   :  { %4136 = vpow2.f32 %v958_v9 }
 0x4ac   :  { %4138 = vpow2.f32 %v960_v10 }
 0x4b2   :  { %v4131_v11 = vpop.eup %4130 }
 0x4b3   :  { %v995_v13 = vmul.f32 %v4131_v11, %v4123_v42  ;;  %v4133_v6 = vpop.eup %4132 }
 0x4b4   :  { %v4135_v16 = vpop.eup %4134  ;;  %v974_v18 = vsel %vm913_vm6, %v4133_v6, 0.0 }
 0x4b5   :  { %v1003_v15 = vpack.c.bf16 %v995_v13, %v995_v13  ;;  %v4655_v17 = vpop.eup %4136  ;;  %v977_v20 = vsel %vm913_vm6, %v4135_v16, 0.0 }
 0x4b6   :  { %v4659_v21 = vpop.eup %4138  ;;  %v980_v22 = vsel %vm913_vm6, %v4655_v17, 0.0 }
 0x4b7   :  { %3709 = vmatmul.mubr.msk.bf16.vlgmr.msra.gmra.mrb[28].mxu1 %vm913_vm6, %v1003_v15  ;;  %v983_v23 = vsel %vm913_vm6, %v4659_v21, 0.0 }
 0x4b8   :  { %3720 = vmatprep.mubr.msk.bf16.mxu1 %vm4347_vm3, %v4346_v24 }
 0x4b9   :  { %v964_v12 = vpop.xlane.xlu1 %963 }
 0x4ba   :  { %4140 = vrcp.f32 %v964_v12  ;;  %v4002_v12 = vld [vmem:[#allocation7] sm:$0xff]  }
 0x4be   :  { %975 = vadd.xlane.f32.xlu1 %v974_v18  ;;  %978 = vadd.xlane.f32.xlu0 %v977_v20 }
 0x4c2   :  { %981 = vadd.xlane.f32.xlu1 %v980_v22  ;;  %984 = vadd.xlane.f32.xlu0 %v983_v23 }
 0x4c4   :  { %v4141_v25 = vpop.eup %4140 }
 0x4c5   :  { %v994_v26 = vmul.f32 %v4141_v25, %v4125_v45 }
 0x4c7   :  { %v1002_v27 = vpack.c.bf16 %v994_v26, %v994_v26 }
 0x4c9   :  { %3703 = vmatmul.mubr.msk.bf16.vlgmr.msra.gmra.mrb[16].mxu0 %vm913_vm6, %v1002_v27 }
 0x4ca   :  { %3713 = vmatpush3.bf16.msra.mxu0 %v1107_v28  ;;  %3714 = vmatprep.mubr.msk.bf16.mxu0 %vm4347_vm3, %v4346_v24  ;;  %v4005_v28 = vld [vmem:[#allocation7 + $0x18] sm:$0xff]  }
 0x4cb   :  { %3724 = vmatprep.subr.bf16.mxu0 %v4346_v24 }
 0x4d3   :  { %530 = vrot.lane.b32.xlu1 %v4586_v34, %s4349_s25 }
 0x4d8   :  { %528 = vrot.lane.b32.xlu0 %v4579_v31, %s4349_s25 }
 0x512   :  { %v970_v29 = vpop.xlane.xlu1 %969 }
 0x513   :  { %4142 = vrcp.f32 %v970_v29 }
 0x516   :  { %v973_v30 = vpop.xlane.xlu0 %972  ;;  %v525_v36 = vpop.permute.xlu1 %524 }
 0x517   :  { %4144 = vrcp.f32 %v973_v30  ;;  %v1199_v34 = vsel %vm1013_vm5, %v525_v36, 0  ;;  %v4006_v30 = vld [vmem:[#allocation7 + $0x20] sm:$0xff]   ;;  %v4009_v36 = vld [vmem:[#allocation7 + $0x38] sm:$0xff]  }
 0x51a   :  { %v523_v32 = vpop.permute.xlu0 %522  ;;  %v527_v44 = vpop.permute.xlu1 %526 }
 0x51b   :  { %v1153_v33 = vsel %vm1013_vm5, %v523_v32, 0  ;;  %v1245_v47 = vsel %vm1013_vm5, %v527_v44, 0  ;;  %v4007_v32 = vld [vmem:[#allocation7 + $0x28] sm:$0xff]  }
 0x51c   :  { %3719 = vmatpush3.bf16.msra.mxu1 %v1153_v33  ;;  %v4008_v33 = vld [vmem:[#allocation7 + $0x30] sm:$0xff]  }
 0x51d   :  { %v4143_v35 = vpop.eup %4142  ;;  %3730 = vmatprep.subr.bf16.mxu1 %v4346_v24 }
 0x51e   :  { %v996_v40 = vmul.f32 %v4143_v35, %v4637_v58 }
 0x520   :  { %v1004_v42 = vpack.c.bf16 %v996_v40, %v996_v40 }
 0x521   :  { %v4145_v43 = vpop.eup %4144 }
 0x522   :  { %v997_v31 = vmul.f32 %v4145_v43, %v4641_v59  ;;  %3715 = vmatmul.mubr.msk.bf16.vlgmr.msra.gmra.mrb[20].mxu0 %vm913_vm6, %v1004_v42 }
 0x523   :  { %3725 = vmatpush3.bf16.msra.mxu0 %v1199_v34  ;;  %3726 = vmatprep.mubr.msk.bf16.mxu0 %vm4347_vm3, %v4346_v24 }
 0x524   :  { %v1005_v45 = vpack.c.bf16 %v997_v31, %v997_v31  ;;  %3736 = vmatprep.subr.bf16.mxu0 %v4346_v24 }
 0x526   :  { %3721 = vmatmul.mubr.msk.bf16.vlgmr.msra.gmra.mrb[32].mxu1 %vm913_vm6, %v1005_v45 }
 0x527   :  { %3731 = vmatpush3.bf16.msra.mxu1 %v1245_v47  ;;  %3732 = vmatprep.mubr.msk.bf16.mxu1 %vm4347_vm3, %v4346_v24 }
 0x528   :  { %3742 = vmatprep.subr.bf16.mxu1 %v4346_v24 }
 0x54b   :  { %v976_v51 = vpop.xlane.xlu1 %975  ;;  %v979_v53 = vpop.xlane.xlu0 %978 }
 0x54c   :  { %4146 = vrcp.f32 %v976_v51 }
 0x54d   :  { %4148 = vrcp.f32 %v979_v53 }
 0x54f   :  { %v982_v54 = vpop.xlane.xlu1 %981  ;;  %v985_v55 = vpop.xlane.xlu0 %984 }
 0x550   :  { %4150 = vrcp.f32 %v982_v54 }
 0x551   :  { %4152 = vrcp.f32 %v985_v55 }
 0x553   :  { %v529_v59 = vpop.permute.xlu0 %528  ;;  %v531_v60 = vpop.permute.xlu1 %530 }
 0x554   :  { %v1291_v1 = vsel %vm1013_vm5, %v529_v59, 0  ;;  %v1337_v2 = vsel %vm1013_vm5, %v531_v60, 0 }
 0x556   :  { %v4147_v48 = vpop.eup %4146 }
 0x557   :  { %v4149_v56 = vpop.eup %4148  ;;  %v998_v58 = vmul.f32 %v4147_v48, %v4133_v6 }
 0x558   :  { %v999_v41 = vmul.f32 %v4149_v56, %v4135_v16  ;;  %v4003_v16 = vld [vmem:[#allocation7 + $0x8] sm:$0xff]  }
 0x559   :  { %v1006_v57 = vpack.c.bf16 %v998_v58, %v998_v58 }
 0x55a   :  { %v4151_v61 = vpop.eup %4150  ;;  %v1007_v62 = vpack.c.bf16 %v999_v41, %v999_v41 }
 0x55b   :  { %v4153_v63 = vpop.eup %4152  ;;  %3727 = vmatmul.mubr.msk.bf16.vlgmr.msra.gmra.mrb[24].mxu0 %vm913_vm6, %v1006_v57  ;;  %v1000_v3 = vmul.f32 %v4151_v61, %v4655_v17 }
 0x55c   :  { %3733 = vmatmul.mubr.msk.bf16.vlgmr.msra.gmra.mrb[36].mxu1 %vm913_vm6, %v1007_v62  ;;  %3737 = vmatpush3.bf16.msra.mxu0 %v1291_v1  ;;  %v1001_v4 = vmul.f32 %v4153_v63, %v4659_v21  ;;  %v4004_v21 = vld [vmem:[#allocation7 + $0x10] sm:$0xff]  }
 0x55d   :  { %3743 = vmatpush3.bf16.msra.mxu1 %v1337_v2  ;;  %3738 = vmatprep.mubr.msk.bf16.mxu0 %vm4347_vm3, %v4346_v24  ;;  %v1008_v5 = vpack.c.bf16 %v1000_v3, %v1000_v3 }
 0x55e   :  { %3744 = vmatprep.mubr.msk.bf16.mxu1 %vm4347_vm3, %v4346_v24  ;;  %3748 = vmatprep.subr.bf16.mxu0 %v4346_v24  ;;  %v1009_v7 = vpack.c.bf16 %v1001_v4, %v1001_v4 }
 0x563   :  { %3739 = vmatmul.mubr.msk.bf16.vlgmr.msra.gmra.mrb[28].mxu0 %vm913_vm6, %v1008_v5 }
 0x564   :  { %3745 = vmatmul.mubr.msk.bf16.vlgmr.msra.gmra.mrb[40].mxu1 %vm913_vm6, %v1009_v7  ;;  %3764 = vmatprep.mubr.msk.bf16.mxu0 %vm4347_vm3, %v4346_v24 }
 0x565   :  { %1778 = vmatprep.mubr.bf16.mxu1 %v4345_v0  ;;  %3749 = vmatpush3.bf16.msra.mxu0 %v4002_v12 }
 0x566   :  { %3750 = vmatprep.subr.bf16.mxu0 %v4346_v24 }
 0x569   :  { %3751 = vmatpush3.bf16.msra.mxu0 %v4003_v16 }
 0x56a   :  { %3752 = vmatprep.subr.bf16.mxu0 %v4346_v24 }
 0x56d   :  { %3753 = vmatpush3.bf16.msra.mxu0 %v4004_v21 }
 0x56e   :  { %3754 = vmatprep.subr.bf16.mxu0 %v4346_v24 }
 0x571   :  { %3755 = vmatpush3.bf16.msra.mxu0 %v4005_v28  ;;  %v4014_v28 = vld [vmem:[#allocation5 + $0xd8] ss:$12 sps:$4 sm:$0xff]  }
 0x572   :  { %3756 = vmatprep.subr.bf16.mxu0 %v4346_v24 }
 0x575   :  { %3757 = vmatpush3.bf16.msra.mxu0 %v4006_v30 }
 0x576   :  { %3758 = vmatprep.subr.bf16.mxu0 %v4346_v24 }
 0x579   :  { %3759 = vmatpush3.bf16.msra.mxu0 %v4007_v32 }
 0x57a   :  { %3760 = vmatprep.subr.bf16.mxu0 %v4346_v24 }
 0x57d   :  { %3761 = vmatpush3.bf16.msra.mxu0 %v4008_v33 }
 0x57e   :  { %3762 = vmatprep.subr.bf16.mxu0 %v4346_v24 }
 0x581   :  { %3763 = vmatpush3.bf16.msra.mxu0 %v4009_v36 }
 0x582   :  { %3768 = vmatprep.subr.bf16.mxu0 %v4346_v24 }
 0x58a   :  { %v4704_v8 = vpop.f32.mrb[28].mxu1 }
 0x58b   :  { %v3710_v9 = vpop.f32.mrb[29].mxu1 }
 0x58c   :  { %v1100_v10 = vpop.f32.mrb[30].mxu1 }
 0x58d   :  { %v3711_v11 = vpop.f32.mrb[31].mxu1 }
 0x59c   :  { %v4706_v13 = vpop.f32.mrb[16].mxu0 }
 0x59d   :  { %v3704_v14 = vpop.f32.mrb[17].mxu0 }
 0x59e   :  { %v1054_v15 = vpop.f32.mrb[18].mxu0 }
 0x59f   :  { %v3705_v6 = vpop.f32.mrb[19].mxu0 }
 0x5f5   :  { %v1143_v17 = vpop.f32.mrb[20].mxu0 }
 0x5f6   :  { %v3716_v18 = vpop.f32.mrb[21].mxu0 }
 0x5f7   :  { %v1146_v20 = vpop.f32.mrb[22].mxu0 }
 0x5f8   :  { %v3717_v22 = vpop.f32.mrb[23].mxu0 }
 0x5f9   :  { %v1189_v23 = vpop.f32.mrb[32].mxu1  ;;  %v4010_v22 = vld [vmem:[#allocation5 + $0xc0] ss:$12 sps:$4 sm:$0xff]  }
 0x5fa   :  { %v3940_v25 = vpack.i.bf16 %v1189_v23, %v1143_v17  ;;  %v3722_v26 = vpop.f32.mrb[33].mxu1  ;;  %v4012_v23 = vld [vmem:[#allocation5 + $0xc4] ss:$12 sps:$4 sm:$0xff]  }
 0x5fb   :  { %v1192_v27 = vpop.f32.mrb[34].mxu1  ;;  %v4016_v26 = vld [vmem:[#allocation5 + $0xdc] ss:$12 sps:$4 sm:$0xff]   ;;  %1746 = vmatprep.subr.bf16.mxu1 %v4012_v23 }
 0x5fc   :  { %3941 = vrot.lane.b32.xlu0 %v3940_v25, %s4349_s25  ;;  %v3723_v29 = vpop.f32.mrb[35].mxu1  ;;  %v4013_v25 = vld [vmem:[#allocation5 + $0xc8] ss:$12 sps:$4 sm:$0xff]   ;;  %v4017_v27 = vld [vmem:[#allocation5 + $0xe0] ss:$12 sps:$4 sm:$0xff]   ;;  %1747 = vmatpush1.bf16.msra.mxu1 %v4010_v22 }
 0x5fd   :  { %1748 = vmatprep.subr.bf16.mxu1 %v4016_v26 }
 0x600   :  { %1749 = vmatpush1.bf16.msra.mxu1 %v4014_v28 }
 0x62e   :  { %v1235_v35 = vpop.f32.mrb[24].mxu0 }
 0x62f   :  { %v1281_v40 = vpop.f32.mrb[36].mxu1  ;;  %v3728_v42 = vpop.f32.mrb[25].mxu0 }
 0x630   :  { %v3945_v43 = vpack.i.bf16 %v1281_v40, %v1235_v35  ;;  %v3734_v34 = vpop.f32.mrb[37].mxu1  ;;  %v1238_v31 = vpop.f32.mrb[26].mxu0  ;;  %v4020_v40 = vld [vmem:[#allocation5 + $0xf4] ss:$12 sps:$4 sm:$0xff]   ;;  %v4018_v42 = vld [vmem:[#allocation5 + $0xf0] ss:$12 sps:$4 sm:$0xff]  }
 0x631   :  { %v1284_v44 = vpop.f32.mrb[38].mxu1  ;;  %v3729_v45 = vpop.f32.mrb[27].mxu0  ;;  %1750 = vmatprep.subr.bf16.mxu1 %v4020_v40  ;;  %v4024_v34 = vld [vmem:[#allocation5 + $0x10c] ss:$12 sps:$4 sm:$0xff]   ;;  %v4022_v31 = vld [vmem:[#allocation5 + $0x108] ss:$12 sps:$4 sm:$0xff]  }
 0x632   :  { %3946 = vrot.lane.b32.xlu1 %v3945_v43, %s4342_s2  ;;  %v3735_v47 = vpop.f32.mrb[39].mxu1  ;;  %v4021_v43 = vld [vmem:[#allocation5 + $0xf8] ss:$12 sps:$4 sm:$0xff]   ;;  %1751 = vmatpush1.bf16.msra.mxu1 %v4018_v42  ;;  %v4025_v44 = vld [vmem:[#allocation5 + $0x110] ss:$12 sps:$4 sm:$0xff]  }
 0x633   :  { %1752 = vmatprep.subr.bf16.mxu1 %v4024_v34  ;;  %v4028_v45 = vld [vmem:[#allocation5 + $0x124] ss:$12 sps:$4 sm:$0xff]   ;;  %v4026_v47 = vld [vmem:[#allocation5 + $0x120] ss:$12 sps:$4 sm:$0xff]  }
 0x636   :  { %v1327_v51 = vpop.f32.mrb[28].mxu0  ;;  %1753 = vmatpush1.bf16.msra.mxu1 %v4022_v31 }
 0x637   :  { %v1373_v53 = vpop.f32.mrb[40].mxu1  ;;  %v3740_v54 = vpop.f32.mrb[29].mxu0  ;;  %1754 = vmatprep.subr.bf16.mxu1 %v4028_v45 }
 0x638   :  { %v3950_v55 = vpack.i.bf16 %v1373_v53, %v1327_v51  ;;  %v3746_v48 = vpop.f32.mrb[41].mxu1  ;;  %v1330_v56 = vpop.f32.mrb[30].mxu0  ;;  %v4029_v51 = vld [vmem:[#allocation5 + $0x128] ss:$12 sps:$4 sm:$0xff]   ;;  %v4030_v54 = vld [vmem:[#allocation5 + $0x138] ss:$12 sps:$4 sm:$0xff]  }
 0x639   :  { %v1376_v58 = vpop.f32.mrb[42].mxu1  ;;  %v3741_v41 = vpop.f32.mrb[31].mxu0  ;;  %v4032_v53 = vld [vmem:[#allocation5 + $0x13c] ss:$12 sps:$4 sm:$0xff]   ;;  %v4036_v48 = vld [vmem:[#allocation5 + $0x154] ss:$12 sps:$4 sm:$0xff]  }
 0x63a   :  { %3951 = vrot.lane.b32.xlu0 %v3950_v55, %s4348_s24  ;;  %v3747_v59 = vpop.f32.mrb[43].mxu1  ;;  %1755 = vmatpush1.bf16.msra.mxu1 %v4026_v47  ;;  %v4033_v55 = vld [vmem:[#allocation5 + $0x140] ss:$12 sps:$4 sm:$0xff]   ;;  %v4034_v56 = vld [vmem:[#allocation5 + $0x150] ss:$12 sps:$4 sm:$0xff]  }
 0x63b   :  { %1756 = vmatprep.subr.bf16.mxu1 %v4032_v53  ;;  %v4037_v58 = vld [vmem:[#allocation5 + $0x158] ss:$12 sps:$4 sm:$0xff]   ;;  %v4038_v59 = vld [vmem:[#allocation5 + $0x168] ss:$12 sps:$4 sm:$0xff]  }
 0x63c   :  { %v4040_v41 = vld [vmem:[#allocation5 + $0x16c] ss:$12 sps:$4 sm:$0xff]  }
 0x63e   :  { %1757 = vmatpush1.bf16.msra.mxu1 %v4030_v54 }
 0x63f   :  { %1758 = vmatprep.subr.bf16.mxu1 %v4036_v48 }
 0x642   :  { %1759 = vmatpush1.bf16.msra.mxu1 %v4034_v56 }
 0x643   :  { %1760 = vmatprep.subr.bf16.mxu1 %v4040_v41 }
 0x646   :  { %1761 = vmatpush1.bf16.msra.mxu1 %v4038_v59 }
 0x647   :  { %3788 = vmatprep.subr.bf16.mxu1 %v4346_v24 }
 0x66e   :  { %v3942_v60 = vpop.permute.xlu0 %3941 }
 0x66f   :  { %v3944_v61 = vunpack.i.h.bf16 %v3942_v60  ;;  %v3943_v62 = vunpack.i.l.bf16 %v3942_v60  ;;  %v4041_v60 = vld [vmem:[#allocation5 + $0x170] ss:$12 sps:$4 sm:$0xff]  }
 0x671   :  { %v1404_v3 = vsel %vm544_vm4, %v4704_v8, %v3944_v61  ;;  %v1403_v4 = vsel %vm544_vm4, %v4706_v13, %v3943_v62  ;;  %v3377_v8 = vld [vmem:[%s5002_s6] ss:$0 sm:$0xff] }
 0x6a4   :  { %v3947_v57 = vpop.permute.xlu1 %3946 }
 0x6a5   :  { %v3949_v63 = vunpack.i.h.bf16 %v3947_v57  ;;  %v3948_v1 = vunpack.i.l.bf16 %v3947_v57 }
 0x6a7   :  { %v1406_v9 = vsel %vm138_vm0, %v1404_v3, %v3949_v63  ;;  %v1405_v10 = vsel %vm138_vm0, %v1403_v4, %v3948_v1  ;;  %v3386_v4 = vld [vmem:[%s5003_s7] ss:$0 sm:$0xff] }
 0x6ac   :  { %v3952_v2 = vpop.permute.xlu0 %3951 }
 0x6ad   :  { %v3954_v5 = vunpack.i.h.bf16 %v3952_v2  ;;  %v3953_v7 = vunpack.i.l.bf16 %v3952_v2 }
 0x6af   :  { %v1409_v11 = vsel %vm1407_vm7, %v1406_v9, %v3954_v5  ;;  %v1408_v14 = vsel %vm1407_vm7, %v1405_v10, %v3953_v7 }
 0x6b0   :  { %v1410_v15 = vpack.c.bf16 %v1409_v11, %v1408_v14  ;;  %v3387_v11 = vld [vmem:[%s5004_s8] ss:$0 sm:$0xff] }
 0x6b2   :  { %3765 = vmatmul.mubr.bf16.vlgmr.msra.gmra.mrb[32].mxu0 %v1410_v15 }
 0x6b3   :  { %3784 = vmatprep.mubr.msk.bf16.mxu0 %vm4347_vm3, %v4346_v24  ;;  %3769 = vmatpush3.bf16.msra.mxu0 %v4013_v25 }
 0x6b4   :  { %3770 = vmatprep.subr.bf16.mxu0 %v4346_v24 }
 0x6b7   :  { %3771 = vmatpush3.bf16.msra.mxu0 %v4017_v27 }
 0x6b8   :  { %3772 = vmatprep.subr.bf16.mxu0 %v4346_v24 }
 0x6bb   :  { %3773 = vmatpush3.bf16.msra.mxu0 %v4021_v43 }
 0x6bc   :  { %3774 = vmatprep.subr.bf16.mxu0 %v4346_v24 }
 0x6bf   :  { %3775 = vmatpush3.bf16.msra.mxu0 %v4025_v44 }
 0x6c0   :  { %3776 = vmatprep.subr.bf16.mxu0 %v4346_v24 }
 0x6c3   :  { %3777 = vmatpush3.bf16.msra.mxu0 %v4029_v51 }
 0x6c4   :  { %3778 = vmatprep.subr.bf16.mxu0 %v4346_v24 }
 0x6c7   :  { %3779 = vmatpush3.bf16.msra.mxu0 %v4033_v55 }
 0x6c8   :  { %3780 = vmatprep.subr.bf16.mxu0 %v4346_v24 }
 0x6cb   :  { %3781 = vmatpush3.bf16.msra.mxu0 %v4037_v58 }
 0x6cc   :  { %3782 = vmatprep.subr.bf16.mxu0 %v4346_v24 }
 0x6cf   :  { %3783 = vmatpush3.bf16.msra.mxu0 %v4041_v60 }
 0x6d0   :  { %3812 = vmatprep.subr.bf16.mxu0 %v4346_v24 }
 0x785   :  { %v1516_v13 = vpop.f32.mrb[32].mxu0 }
 0x786   :  { %v1517_v6 = vadd.f32 %v3377_v8, %v1516_v13  ;;  %v3766_v12 = vpop.f32.mrb[33].mxu0 }
 0x787   :  { %v1519_v16 = vpop.f32.mrb[34].mxu0 }
 0x788   :  { %v1520_v17 = vadd.f32 %v3377_v8, %v1519_v16  ;;  %v3767_v18 = vpop.f32.mrb[35].mxu0  ;;  %v1523_v20 = vadd.f32 %v1517_v6, %v4512_v39  ;;  %v3388_v6 = vld [vmem:[%s5000_s4 + $0x3] sm:$0x7] }
 0x789   :  { %v1606_v12 = vrot.slane %v3388_v6, %v4531_v50  ;;  %v1610_v16 = vrot.slane %v3388_v6, %v4537_v52  ;;  %v1614_v55 = vrot.slane %v3388_v6, %v267_v19 }
 0x78a   :  { %1525 = vadd.xlane.f32.xlu1 %v1523_v20  ;;  %v1524_v21 = vadd.f32 %v4510_v38, %v1520_v17 }
 0x78c   :  { %1527 = vadd.xlane.f32.xlu0 %v1524_v21 }
 0x817   :  { %v1526_v39 = vpop.xlane.xlu1 %1525 }
 0x818   :  { %v1530_v29 = vmul.f32 0.0078125, %v1526_v39 }
 0x819   :  { %v1528_v38 = vpop.xlane.xlu0 %1527 }
 0x81a   :  { %v1532_v30 = vsub.f32 %v1523_v20, %v1530_v29  ;;  %v1531_v32 = vmul.f32 0.0078125, %v1528_v38 }
 0x81c   :  { %v1533_v33 = vsub.f32 %v1524_v21, %v1531_v32  ;;  %v1534_v35 = vmul.f32 %v1532_v30, %v1532_v30 }
 0x81e   :  { %1536 = vadd.xlane.f32.xlu0 %v1534_v35  ;;  %v1535_v36 = vmul.f32 %v1533_v33, %v1533_v33 }
 0x820   :  { %1538 = vadd.xlane.f32.xlu1 %v1535_v36 }
 0x8ab   :  { %v1537_v57 = vpop.xlane.xlu0 %1536 }
 0x8ac   :  { %v1540_v61 = vmul.f32 0.0078125, %v1537_v57 }
 0x8ad   :  { %v1539_v62 = vpop.xlane.xlu1 %1538 }
 0x8ae   :  { %v1542_v63 = vadd.f32 1e-05, %v1540_v61  ;;  %v1541_v1 = vmul.f32 0.0078125, %v1539_v62 }
 0x8b0   :  { %4154 = vrsqrt.f32 %v1542_v63  ;;  %v1543_v2 = vadd.f32 1e-05, %v1541_v1 }
 0x8b2   :  { %4156 = vrsqrt.f32 %v1543_v2 }
 0x8ba   :  { %v4155_v3 = vpop.eup %4154 }
 0x8bb   :  { %v1546_v5 = vmul.f32 %v4155_v3, %v1532_v30 }
 0x8bc   :  { %v4157_v7 = vpop.eup %4156 }
 0x8bd   :  { %v1547_v9 = vmul.f32 %v4157_v7, %v1533_v33  ;;  %v1555_v10 = vmul.f32 %v3386_v4, %v1546_v5 }
 0x8bf   :  { %v1556_v14 = vmul.f32 %v3386_v4, %v1547_v9  ;;  %v4749_v15 = vadd.f32 %v3387_v11, %v1555_v10 }
 0x8c1   :  { %v4751_v8 = vadd.f32 %v3387_v11, %v1556_v14 }
 0x8c3   :  { %v1566_v13 = vpack.c.bf16 %v4751_v8, %v4749_v15 }
 0x8c5   :  { %1779 = vmatmul.mubr.bf16.vlgmr.msra.gmra.mrb[44].mxu1 %v1566_v13  ;;  %3785 = vmatmul.mubr.bf16.vlgmr.msra.gmra.mrb[36].mxu0 %v1566_v13 }
 0x8c6   :  { %3790 = vmatprep.mubr.msk.bf16.mxu1 %vm4347_vm3, %v4346_v24  ;;  %3814 = vmatprep.mubr.msk.bf16.mxu0 %vm4347_vm3, %v4346_v24 }
 0x998   :  { %v1780_v17 = vpop.f32.mrb[44].mxu1  ;;  %v1823_v18 = vpop.f32.mrb[36].mxu0 }
 0x999   :  { %v1781_v20 = vadd.f32 %v1780_v17, %v1606_v12  ;;  %v1782_v21 = vpop.f32.mrb[45].mxu1  ;;  %v3786_v22 = vpop.f32.mrb[37].mxu0  ;;  %v1824_v58 = vadd.f32 %v1823_v18, %v1614_v55 }
 0x99a   :  { %v1783_v23 = vadd.f32 %v1782_v21, %v1610_v16  ;;  %v1784_v25 = vpop.f32.mrb[46].mxu1  ;;  %v4764_v26 = vpop.f32.mrb[38].mxu0 }
 0x99b   :  { %v1785_v27 = vadd.f32 %v1784_v25, %v1606_v12  ;;  %v1786_v28 = vpop.f32.mrb[47].mxu1  ;;  %v3787_v39 = vpop.f32.mrb[39].mxu0  ;;  %v4802_v19 = vpack.c.bf16 %v1824_v58, %v1824_v58  ;;  %v1827_v61 = vadd.f32 %v4764_v26, %v1614_v55 }
 0x99c   :  { %v3499_v29 = vpack.c.bf16 %v1783_v23, %v1781_v20  ;;  %v1787_v38 = vadd.f32 %v1786_v28, %v1610_v16 }
 0x99d   :  { %v2346_v57 = vsel %vm1013_vm5, %v4802_v19, 0  ;;  %v4817_v63 = vpack.c.bf16 %v1827_v61, %v1827_v61 }
 0x99e   :  { %v3501_v30 = vpack.c.bf16 %v1787_v38, %v1785_v27  ;;  %1846 = vrot.lane.b32.xlu0 %v3499_v29, %s4348_s24  ;;  %v1858_v32 = vrot.slane %v3499_v29, 4 }
 0x99f   :  { %v2392_v1 = vsel %vm1013_vm5, %v4817_v63, 0 }
 0x9a0   :  { %1848 = vrot.lane.b32.xlu1 %v3501_v30, %s4348_s24  ;;  %v1882_v33 = vsel %vm544_vm4, %v1858_v32, 0  ;;  %v1859_v35 = vrot.slane %v3501_v30, 4 }
 0x9a1   :  { %3789 = vmatpush3.bf16.xpose.msra.mxu1 %v1882_v33 }
 0x9a2   :  { %1852 = vrot.lane.b32.xlu0 %v3501_v30, %s4342_s2  ;;  %3794 = vmatprep.subr.bf16.mxu1 %v4346_v24  ;;  %v1928_v36 = vsel %vm544_vm4, %v1859_v35, 0 }
 0x9a4   :  { %1850 = vrot.lane.b32.xlu1 %v3499_v29, %s4342_s2 }
 0x9a6   :  { %1856 = vrot.lane.b32.xlu0 %v3501_v30, %s4349_s25 }
 0x9a8   :  { %1854 = vrot.lane.b32.xlu1 %v3499_v29, %s4349_s25  ;;  %3791 = vmatmul.mubr.msk.bf16.vlgmr.msra.gmra.mrb[48].mxu1 %vm544_vm4, %v3499_v29 }
 0x9a9   :  { %3795 = vmatpush3.bf16.xpose.msra.mxu1 %v1928_v36  ;;  %3796 = vmatprep.mubr.msk.bf16.mxu1 %vm4347_vm3, %v4346_v24 }
 0x9aa   :  { %3800 = vmatprep.subr.bf16.mxu1 %v4346_v24 }
 0x9b0   :  { %3797 = vmatmul.mubr.msk.bf16.vlgmr.msra.gmra.mrb[52].mxu1 %vm544_vm4, %v3501_v30 }
 0x9b1   :  { %3802 = vmatprep.mubr.msk.bf16.mxu1 %vm4347_vm3, %v4346_v24 }
 0xa10   :  { %v1847_v40 = vpop.permute.xlu0 %1846 }
 0xa11   :  { %v1860_v42 = vrot.slane %v1847_v40, 4 }
 0xa12   :  { %v1849_v43 = vpop.permute.xlu1 %1848 }
 0xa13   :  { %v1974_v34 = vsel %vm544_vm4, %v1860_v42, 0  ;;  %v1861_v44 = vrot.slane %v1849_v43, 4 }
 0xa14   :  { %3801 = vmatpush3.bf16.xpose.msra.mxu1 %v1974_v34  ;;  %v1853_v54 = vpop.permute.xlu0 %1852 }
 0xa15   :  { %3806 = vmatprep.subr.bf16.mxu1 %v4346_v24  ;;  %v2020_v53 = vsel %vm544_vm4, %v1861_v44, 0  ;;  %v1863_v56 = vrot.slane %v1853_v54, 4 }
 0xa16   :  { %v1851_v31 = vpop.permute.xlu1 %1850 }
 0xa17   :  { %v1862_v45 = vrot.slane %v1851_v31, 4  ;;  %v2112_v59 = vsel %vm544_vm4, %v1863_v56, 0 }
 0xa18   :  { %v1857_v49 = vpop.permute.xlu0 %1856 }
 0xa19   :  { %v2066_v47 = vsel %vm544_vm4, %v1862_v45, 0  ;;  %v1865_v60 = vrot.slane %v1857_v49, 4 }
 0xa1a   :  { %3813 = vmatpush3.bf16.xpose.msra.mxu0 %v2066_v47  ;;  %v1855_v51 = vpop.permute.xlu1 %1854 }
 0xa1b   :  { %3803 = vmatmul.mubr.msk.bf16.vlgmr.msra.gmra.mrb[56].mxu1 %vm544_vm4, %v1847_v40  ;;  %3824 = vmatprep.subr.bf16.mxu0 %v4346_v24  ;;  %v1864_v48 = vrot.slane %v1855_v51, 4  ;;  %v2204_v62 = vsel %vm544_vm4, %v1865_v60, 0 }
 0xa1c   :  { %3807 = vmatpush3.bf16.xpose.msra.mxu1 %v2020_v53  ;;  %3808 = vmatprep.mubr.msk.bf16.mxu1 %vm4347_vm3, %v4346_v24 }
 0xa1d   :  { %3818 = vmatprep.subr.bf16.mxu1 %v4346_v24  ;;  %v2158_v41 = vsel %vm544_vm4, %v1864_v48, 0 }
 0xa21   :  { %3815 = vmatmul.mubr.msk.bf16.vlgmr.msra.gmra.mrb[40].mxu0 %vm544_vm4, %v1851_v31 }
 0xa22   :  { %3825 = vmatpush3.bf16.xpose.msra.mxu0 %v2158_v41  ;;  %3826 = vmatprep.mubr.msk.bf16.mxu0 %vm4347_vm3, %v4346_v24 }
 0xa23   :  { %3809 = vmatmul.mubr.msk.bf16.vlgmr.msra.gmra.mrb[60].mxu1 %vm544_vm4, %v1849_v43  ;;  %3836 = vmatprep.subr.bf16.mxu0 %v4346_v24 }
 0xa24   :  { %3819 = vmatpush3.bf16.xpose.msra.mxu1 %v2112_v59  ;;  %3820 = vmatprep.mubr.msk.bf16.mxu1 %vm4347_vm3, %v4346_v24 }
 0xa25   :  { %3830 = vmatprep.subr.bf16.mxu1 %v4346_v24 }
 0xa29   :  { %3827 = vmatmul.mubr.msk.bf16.vlgmr.msra.gmra.mrb[44].mxu0 %vm544_vm4, %v1855_v51 }
 0xa2a   :  { %3837 = vmatpush3.bf16.msra.mxu0 %v2346_v57  ;;  %3838 = vmatprep.mubr.msk.bf16.mxu0 %vm4347_vm3, %v4346_v24 }
 0xa2b   :  { %3821 = vmatmul.mubr.msk.bf16.vlgmr.msra.gmra.mrb[64].mxu1 %vm544_vm4, %v1853_v54  ;;  %3848 = vmatprep.subr.bf16.mxu0 %v4346_v24 }
 0xa2c   :  { %3831 = vmatpush3.bf16.xpose.msra.mxu1 %v2204_v62  ;;  %3832 = vmatprep.mubr.msk.bf16.mxu1 %vm4347_vm3, %v4346_v24 }
 0xa2d   :  { %3842 = vmatprep.subr.bf16.mxu1 %v4346_v24 }
 0xa33   :  { %3833 = vmatmul.mubr.msk.bf16.vlgmr.msra.gmra.mrb[68].mxu1 %vm544_vm4, %v1857_v49 }
 0xa34   :  { %3843 = vmatpush3.bf16.msra.mxu1 %v2392_v1  ;;  %3844 = vmatprep.mubr.msk.bf16.mxu1 %vm4347_vm3, %v4346_v24 }
 0xa35   :  { %3854 = vmatprep.subr.bf16.mxu1 %v4346_v24 }
 0xa7b   :  { %v1918_v2 = vpop.f32.mrb[48].mxu1 }
 0xa7c   :  { %v1919_v3 = vadd.f32 %v4603_v37, %v1918_v2  ;;  %v3792_v4 = vpop.f32.mrb[49].mxu1 }
 0xa7d   :  { %v1921_v5 = vpop.f32.mrb[50].mxu1 }
 0xa7e   :  { %v3793_v7 = vpop.f32.mrb[51].mxu1  ;;  %v2246_v9 = vsel %vm913_vm6, %v1919_v3, -inf }
 0xa7f   :  { %2247 = vmax.xlane.f32.xlu1 %v2246_v9 }
 0xa83   :  { %v1964_v10 = vpop.f32.mrb[52].mxu1 }
 0xa84   :  { %v1965_v11 = vadd.f32 %v4613_v46, %v1964_v10  ;;  %v3798_v14 = vpop.f32.mrb[53].mxu1 }
 0xa85   :  { %v1967_v13 = vpop.f32.mrb[54].mxu1 }
 0xa86   :  { %v3799_v6 = vpop.f32.mrb[55].mxu1  ;;  %v2249_v12 = vsel %vm913_vm6, %v1965_v11, -inf }
 0xa87   :  { %2250 = vmax.xlane.f32.xlu0 %v2249_v12 }
 0xaee   :  { %v2010_v16 = vpop.f32.mrb[56].mxu1 }
 0xaef   :  { %v2011_v17 = vadd.f32 %v4603_v37, %v2010_v16  ;;  %v3804_v18 = vpop.f32.mrb[57].mxu1 }
 0xaf0   :  { %v2013_v20 = vpop.f32.mrb[58].mxu1 }
 0xaf1   :  { %v3805_v21 = vpop.f32.mrb[59].mxu1  ;;  %v2252_v22 = vsel %vm913_vm6, %v2011_v17, -inf }
 0xaf2   :  { %2253 = vmax.xlane.f32.xlu0 %v2252_v22 }
 0xaf4   :  { %v2102_v23 = vpop.f32.mrb[40].mxu0 }
 0xaf5   :  { %v4832_v25 = vadd.f32 %v4603_v37, %v2102_v23  ;;  %v3816_v26 = vpop.f32.mrb[41].mxu0 }
 0xaf6   :  { %v2056_v27 = vpop.f32.mrb[60].mxu1  ;;  %v2105_v28 = vpop.f32.mrb[42].mxu0 }
 0xaf7   :  { %v2057_v39 = vadd.f32 %v4613_v46, %v2056_v27  ;;  %v3810_v29 = vpop.f32.mrb[61].mxu1  ;;  %v3817_v38 = vpop.f32.mrb[43].mxu0  ;;  %v2258_v30 = vsel %vm913_vm6, %v4832_v25, -inf }
 0xaf8   :  { %2259 = vmax.xlane.f32.xlu0 %v2258_v30  ;;  %v2059_v32 = vpop.f32.mrb[62].mxu1 }
 0xaf9   :  { %v3811_v33 = vpop.f32.mrb[63].mxu1  ;;  %v2255_v35 = vsel %vm913_vm6, %v2057_v39, -inf }
 0xafa   :  { %2256 = vmax.xlane.f32.xlu1 %v2255_v35 }
 0xafc   :  { %v2194_v36 = vpop.f32.mrb[44].mxu0 }
 0xafd   :  { %v4839_v40 = vadd.f32 %v4603_v37, %v2194_v36  ;;  %v3828_v42 = vpop.f32.mrb[45].mxu0 }
 0xafe   :  { %v2148_v43 = vpop.f32.mrb[64].mxu1  ;;  %v2197_v34 = vpop.f32.mrb[46].mxu0 }
 0xaff   :  { %v2149_v31 = vadd.f32 %v4613_v46, %v2148_v43  ;;  %v3822_v44 = vpop.f32.mrb[65].mxu1  ;;  %v3829_v45 = vpop.f32.mrb[47].mxu0  ;;  %v2264_v47 = vsel %vm913_vm6, %v4839_v40, -inf }
 0xb00   :  { %2265 = vmax.xlane.f32.xlu0 %v2264_v47  ;;  %v2151_v51 = vpop.f32.mrb[66].mxu1 }
 0xb01   :  { %v3823_v53 = vpop.f32.mrb[67].mxu1  ;;  %v2261_v54 = vsel %vm913_vm6, %v2149_v31, -inf }
 0xb02   :  { %2262 = vmax.xlane.f32.xlu1 %v2261_v54 }
 0xb06   :  { %v2240_v55 = vpop.f32.mrb[68].mxu1 }
 0xb07   :  { %v2241_v37 = vadd.f32 %v4613_v46, %v2240_v55  ;;  %v3834_v48 = vpop.f32.mrb[69].mxu1 }
 0xb08   :  { %v2243_v56 = vpop.f32.mrb[70].mxu1 }
 0xb09   :  { %v3835_v58 = vpop.f32.mrb[71].mxu1  ;;  %v2267_v41 = vsel %vm913_vm6, %v2241_v37, -inf }
 0xb0a   :  { %2268 = vmax.xlane.f32.xlu1 %v2267_v41 }
 0xb0c   :  { %v2248_v59 = vpop.xlane.xlu1 %2247 }
 0xb0d   :  { %v2270_v49 = vsub.f32 %v1919_v3, %v2248_v59 }
 0xb0f   :  { %v2278_v60 = vmul.f32 1.442695, %v2270_v49 }
 0xb11   :  { %4158 = vpow2.f32 %v2278_v60 }
 0xb14   :  { %v2251_v57 = vpop.xlane.xlu0 %2250 }
 0xb15   :  { %v2271_v61 = vsub.f32 %v1965_v11, %v2251_v57 }
 0xb16   :  { %1866 = vrot.lane.b32.xlu0 %v4802_v19, %s4348_s24 }
 0xb17   :  { %v2280_v62 = vmul.f32 1.442695, %v2271_v61 }
 0xb19   :  { %4160 = vpow2.f32 %v2280_v62 }
 0xb1b   :  { %1868 = vrot.lane.b32.xlu1 %v4817_v63, %s4348_s24  ;;  %v4159_v46 = vpop.eup %4158 }
 0xb1c   :  { %v2294_v1 = vsel %vm913_vm6, %v4159_v46, 0.0 }
 0xb23   :  { %v4852_v2 = vpop.eup %4160 }
 0xb24   :  { %v2297_v4 = vsel %vm913_vm6, %v4852_v2, 0.0 }
 0xb35   :  { %2295 = vadd.xlane.f32.xlu0 %v2294_v1 }
 0xb3f   :  { %2298 = vadd.xlane.f32.xlu1 %v2297_v4 }
 0xb50   :  { %1870 = vrot.lane.b32.xlu1 %v4802_v19, %s4342_s2 }
 0xb7f   :  { %v2254_v3 = vpop.xlane.xlu0 %2253 }
 0xb80   :  { %v2272_v5 = vsub.f32 %v2011_v17, %v2254_v3 }
 0xb82   :  { %v2282_v7 = vmul.f32 1.442695, %v2272_v5 }
 0xb84   :  { %4162 = vpow2.f32 %v2282_v7 }
 0xb87   :  { %v2257_v9 = vpop.xlane.xlu1 %2256 }
 0xb88   :  { %v2273_v10 = vsub.f32 %v2057_v39, %v2257_v9  ;;  %v2260_v39 = vpop.xlane.xlu0 %2259 }
 0xb89   :  { %v2274_v29 = vsub.f32 %v4832_v25, %v2260_v39 }
 0xb8a   :  { %v2284_v11 = vmul.f32 1.442695, %v2273_v10 }
 0xb8b   :  { %v2286_v30 = vmul.f32 1.442695, %v2274_v29 }
 0xb8c   :  { %4164 = vpow2.f32 %v2284_v11 }
 0xb8d   :  { %v2266_v38 = vpop.xlane.xlu0 %2265 }
 0xb8e   :  { %v4858_v14 = vpop.eup %4162  ;;  %v2276_v32 = vsub.f32 %v4839_v40, %v2266_v38 }
 0xb8f   :  { %v2263_v13 = vpop.xlane.xlu1 %2262  ;;  %v2300_v6 = vsel %vm913_vm6, %v4858_v14, 0.0 }
 0xb90   :  { %v2275_v12 = vsub.f32 %v2149_v31, %v2263_v13  ;;  %2301 = vadd.xlane.f32.xlu0 %v2300_v6  ;;  %v2290_v33 = vmul.f32 1.442695, %v2276_v32  ;;  %v4042_v32 = vld [vmem:[#allocation7 + $0x40] sm:$0xff]  }
 0xb91   :  { %v1867_v35 = vpop.permute.xlu0 %1866 }
 0xb92   :  { %v2288_v16 = vmul.f32 1.442695, %v2275_v12  ;;  %v2438_v47 = vsel %vm1013_vm5, %v1867_v35, 0 }
 0xb94   :  { %4166 = vpow2.f32 %v2288_v16 }
 0xb96   :  { %v4862_v18 = vpop.eup %4164 }
 0xb97   :  { %v2269_v20 = vpop.xlane.xlu1 %2268  ;;  %v2303_v17 = vsel %vm913_vm6, %v4862_v18, 0.0 }
 0xb98   :  { %v2277_v21 = vsub.f32 %v2241_v37, %v2269_v20  ;;  %2304 = vadd.xlane.f32.xlu1 %v2303_v17 }
 0xb9a   :  { %v2292_v22 = vmul.f32 1.442695, %v2277_v21 }
 0xb9b   :  { %v1869_v25 = vpop.permute.xlu1 %1868 }
 0xb9c   :  { %4168 = vpow2.f32 %v2292_v22  ;;  %v2484_v55 = vsel %vm1013_vm5, %v1869_v25, 0 }
 0xb9d   :  { %4170 = vpow2.f32 %v2286_v30 }
 0xb9e   :  { %v4866_v23 = vpop.eup %4166  ;;  %4172 = vpow2.f32 %v2290_v33 }
 0xb9f   :  { %v2309_v26 = vsel %vm913_vm6, %v4866_v23, 0.0 }
 0xba0   :  { %2310 = vadd.xlane.f32.xlu1 %v2309_v26 }
 0xba6   :  { %v4870_v27 = vpop.eup %4168  ;;  %1872 = vrot.lane.b32.xlu0 %v4817_v63, %s4342_s2 }
 0xba7   :  { %v2315_v28 = vsel %vm913_vm6, %v4870_v27, 0.0  ;;  %v4880_v36 = vpop.eup %4170 }
 0xba8   :  { %2316 = vadd.xlane.f32.xlu1 %v2315_v28  ;;  %v2306_v43 = vsel %vm913_vm6, %v4880_v36, 0.0  ;;  %v4884_v34 = vpop.eup %4172 }
 0xba9   :  { %v2312_v40 = vsel %vm913_vm6, %v4884_v34, 0.0 }
 0xbb9   :  { %1874 = vrot.lane.b32.xlu1 %v4802_v19, %s4349_s25 }
 0xbc2   :  { %v2296_v42 = vpop.xlane.xlu0 %2295 }
 0xbc3   :  { %4174 = vrcp.f32 %v2296_v42 }
 0xbc5   :  { %2307 = vadd.xlane.f32.xlu0 %v2306_v43  ;;  %v4044_v43 = vld [vmem:[#allocation7 + $0x50] sm:$0xff]  }
 0xbc9   :  { %2313 = vadd.xlane.f32.xlu0 %v2312_v40 }
 0xbcc   :  { %v2299_v31 = vpop.xlane.xlu1 %2298 }
 0xbcd   :  { %v4175_v44 = vpop.eup %4174  ;;  %4176 = vrcp.f32 %v2299_v31 }
 0xbce   :  { %v2326_v19 = vmul.f32 %v4175_v44, %v4159_v46  ;;  %v4045_v44 = vld [vmem:[#allocation7 + $0x58] sm:$0xff]  }
 0xbd0   :  { %v2334_v45 = vpack.c.bf16 %v2326_v19, %v2326_v19  ;;  %v1871_v48 = vpop.permute.xlu1 %1870 }
 0xbd1   :  { %v2530_v49 = vsel %vm1013_vm5, %v1871_v48, 0 }
 0xbd2   :  { %3839 = vmatmul.mubr.msk.bf16.vlgmr.msra.gmra.mrb[48].mxu0 %vm913_vm6, %v2334_v45  ;;  %v4046_v45 = vld [vmem:[#allocation7 + $0x60] sm:$0xff]  }
 0xbd3   :  { %3849 = vmatpush3.bf16.msra.mxu0 %v2438_v47  ;;  %3850 = vmatprep.mubr.msk.bf16.mxu0 %vm4347_vm3, %v4346_v24 }
 0xbd4   :  { %3860 = vmatprep.subr.bf16.mxu0 %v4346_v24 }
 0xbd7   :  { %v4177_v51 = vpop.eup %4176 }
 0xbd8   :  { %v2327_v53 = vmul.f32 %v4177_v51, %v4852_v2 }
 0xbda   :  { %v2335_v54 = vpack.c.bf16 %v2327_v53, %v2327_v53 }
 0xbdc   :  { %3845 = vmatmul.mubr.msk.bf16.vlgmr.msra.gmra.mrb[72].mxu1 %vm913_vm6, %v2335_v54 }
 0xbdd   :  { %3855 = vmatpush3.bf16.msra.mxu1 %v2484_v55  ;;  %3856 = vmatprep.mubr.msk.bf16.mxu1 %vm4347_vm3, %v4346_v24  ;;  %v4047_v55 = vld [vmem:[#allocation7 + $0x68] sm:$0xff]  }
 0xbde   :  { %3866 = vmatprep.subr.bf16.mxu1 %v4346_v24 }
 0xbdf   :  { %1876 = vrot.lane.b32.xlu0 %v4817_v63, %s4349_s25 }
 0xc1d   :  { %v2302_v37 = vpop.xlane.xlu0 %2301 }
 0xc1e   :  { %4178 = vrcp.f32 %v2302_v37  ;;  %v4048_v37 = vld [vmem:[#allocation7 + $0x70] sm:$0xff]  }
 0xc21   :  { %v1873_v61 = vpop.permute.xlu0 %1872 }
 0xc22   :  { %v2576_v46 = vsel %vm1013_vm5, %v1873_v61, 0 }
 0xc25   :  { %v2305_v56 = vpop.xlane.xlu1 %2304 }
 0xc26   :  { %4180 = vrcp.f32 %v2305_v56 }
 0xc28   :  { %v4179_v58 = vpop.eup %4178 }
 0xc29   :  { %v2328_v41 = vmul.f32 %v4179_v58, %v4858_v14 }
 0xc2b   :  { %v2336_v59 = vpack.c.bf16 %v2328_v41, %v2328_v41  ;;  %v4049_v41 = vld [vmem:[#allocation7 + $0x78] sm:$0xff]  }
 0xc2d   :  { %3851 = vmatmul.mubr.msk.bf16.vlgmr.msra.gmra.mrb[52].mxu0 %vm913_vm6, %v2336_v59  ;;  %v2311_v60 = vpop.xlane.xlu1 %2310 }
 0xc2e   :  { %3861 = vmatpush3.bf16.msra.mxu0 %v2530_v49  ;;  %4182 = vrcp.f32 %v2311_v60  ;;  %3862 = vmatprep.mubr.msk.bf16.mxu0 %vm4347_vm3, %v4346_v24 }
 0xc2f   :  { %3872 = vmatprep.subr.bf16.mxu0 %v4346_v24 }
 0xc30   :  { %v4181_v63 = vpop.eup %4180 }
 0xc31   :  { %v2329_v57 = vmul.f32 %v4181_v63, %v4862_v18 }
 0xc33   :  { %v2337_v62 = vpack.c.bf16 %v2329_v57, %v2329_v57 }
 0xc35   :  { %3857 = vmatmul.mubr.msk.bf16.vlgmr.msra.gmra.mrb[76].mxu1 %vm913_vm6, %v2337_v62  ;;  %v2317_v3 = vpop.xlane.xlu1 %2316 }
 0xc36   :  { %3867 = vmatpush3.bf16.msra.mxu1 %v2576_v46  ;;  %3868 = vmatprep.mubr.msk.bf16.mxu1 %vm4347_vm3, %v4346_v24  ;;  %4184 = vrcp.f32 %v2317_v3 }
 0xc37   :  { %3878 = vmatprep.subr.bf16.mxu1 %v4346_v24 }
 0xc38   :  { %v4183_v1 = vpop.eup %4182 }
 0xc39   :  { %v2331_v2 = vmul.f32 %v4183_v1, %v4866_v23  ;;  %v1875_v16 = vpop.permute.xlu1 %1874 }
 0xc3a   :  { %v2622_v17 = vsel %vm1013_vm5, %v1875_v16, 0 }
 0xc3b   :  { %v2339_v4 = vpack.c.bf16 %v2331_v2, %v2331_v2 }
 0xc3d   :  { %3869 = vmatmul.mubr.msk.bf16.vlgmr.msra.gmra.mrb[80].mxu1 %vm913_vm6, %v2339_v4 }
 0xc3e   :  { %3880 = vmatprep.mubr.msk.bf16.mxu1 %vm4347_vm3, %v4346_v24 }
 0xc40   :  { %v4185_v7 = vpop.eup %4184 }
 0xc41   :  { %v2333_v10 = vmul.f32 %v4185_v7, %v4870_v27 }
 0xc43   :  { %v2341_v6 = vpack.c.bf16 %v2333_v10, %v2333_v10 }
 0xc52   :  { %v2308_v5 = vpop.xlane.xlu0 %2307 }
 0xc53   :  { %4186 = vrcp.f32 %v2308_v5 }
 0xc56   :  { %v2314_v9 = vpop.xlane.xlu0 %2313 }
 0xc57   :  { %4188 = vrcp.f32 %v2314_v9 }
 0xc5a   :  { %v1877_v11 = vpop.permute.xlu0 %1876 }
 0xc5b   :  { %v2668_v14 = vsel %vm1013_vm5, %v1877_v11, 0 }
 0xc5c   :  { %3879 = vmatpush3.bf16.msra.mxu1 %v2668_v14 }
 0xc5d   :  { %v4187_v13 = vpop.eup %4186 }
 0xc5e   :  { %v2330_v12 = vmul.f32 %v4187_v13, %v4880_v36  ;;  %v4043_v36 = vld [vmem:[#allocation7 + $0x48] sm:$0xff]  }
 0xc5f   :  { %3881 = vmatmul.mubr.msk.bf16.vlgmr.msra.gmra.mrb[84].mxu1 %vm913_vm6, %v2341_v6 }
 0xc60   :  { %v2338_v18 = vpack.c.bf16 %v2330_v12, %v2330_v12  ;;  %3040 = vmatprep.mubr.bf16.mxu1 %v4345_v0 }
 0xc61   :  { %v4189_v20 = vpop.eup %4188 }
 0xc62   :  { %3863 = vmatmul.mubr.msk.bf16.vlgmr.msra.gmra.mrb[56].mxu0 %vm913_vm6, %v2338_v18  ;;  %v2332_v21 = vmul.f32 %v4189_v20, %v4884_v34 }
 0xc63   :  { %3873 = vmatpush3.bf16.msra.mxu0 %v2622_v17  ;;  %3874 = vmatprep.mubr.msk.bf16.mxu0 %vm4347_vm3, %v4346_v24 }
 0xc64   :  { %3884 = vmatprep.subr.bf16.mxu0 %v4346_v24  ;;  %v2340_v22 = vpack.c.bf16 %v2332_v21, %v2332_v21 }
 0xc6a   :  { %3875 = vmatmul.mubr.msk.bf16.vlgmr.msra.gmra.mrb[60].mxu0 %vm913_vm6, %v2340_v22  ;;  %v3434_v22 = vld [vmem:[%s5002_s6 + $0x1] ss:$0 sm:$0xff] }
 0xc6b   :  { %3900 = vmatprep.mubr.msk.bf16.mxu0 %vm4347_vm3, %v4346_v24  ;;  %3885 = vmatpush3.bf16.msra.mxu0 %v4042_v32  ;;  %v4052_v32 = vld [vmem:[#allocation8 + $0x4] ss:$8 sps:$4 sm:$0xff]  }
 0xc6c   :  { %3886 = vmatprep.subr.bf16.mxu0 %v4346_v24  ;;  %3008 = vmatprep.subr.bf16.mxu1 %v4052_v32 }
 0xc6f   :  { %3887 = vmatpush3.bf16.msra.mxu0 %v4043_v36 }
 0xc70   :  { %3888 = vmatprep.subr.bf16.mxu0 %v4346_v24 }
 0xc73   :  { %3889 = vmatpush3.bf16.msra.mxu0 %v4044_v43 }
 0xc74   :  { %3890 = vmatprep.subr.bf16.mxu0 %v4346_v24 }
 0xc77   :  { %3891 = vmatpush3.bf16.msra.mxu0 %v4045_v44  ;;  %v4056_v44 = vld [vmem:[#allocation8 + $0x20] ss:$8 sps:$4 sm:$0xff]  }
 0xc78   :  { %3892 = vmatprep.subr.bf16.mxu0 %v4346_v24 }
 0xc7b   :  { %3893 = vmatpush3.bf16.msra.mxu0 %v4046_v45  ;;  %v4059_v45 = vld [vmem:[#allocation8 + $0x30] ss:$8 sps:$4 sm:$0xff]  }
 0xc7c   :  { %3894 = vmatprep.subr.bf16.mxu0 %v4346_v24 }
 0xc7f   :  { %3895 = vmatpush3.bf16.msra.mxu0 %v4047_v55  ;;  %v4070_v55 = vld [vmem:[#allocation8 + $0x64] ss:$8 sps:$4 sm:$0xff]  }
 0xc80   :  { %3896 = vmatprep.subr.bf16.mxu0 %v4346_v24 }
 0xc83   :  { %3897 = vmatpush3.bf16.msra.mxu0 %v4048_v37  ;;  %v4068_v37 = vld [vmem:[#allocation8 + $0x60] ss:$8 sps:$4 sm:$0xff]  }
 0xc84   :  { %3898 = vmatprep.subr.bf16.mxu0 %v4346_v24 }
 0xc87   :  { %3899 = vmatpush3.bf16.msra.mxu0 %v4049_v41  ;;  %v4076_v41 = vld [vmem:[#allocation10 + $0x4] ss:$8 sps:$4 sm:$0xff]  }
 0xc88   :  { %3261 = vmatprep.subr.bf16.mxu0 %v4076_v41 }
 0xca5   :  { %v4931_v0 = vpop.f32.mrb[48].mxu0 }
 0xca6   :  { %v3840_v23 = vpop.f32.mrb[49].mxu0 }
 0xca7   :  { %v2385_v26 = vpop.f32.mrb[50].mxu0 }
 0xca8   :  { %v3841_v27 = vpop.f32.mrb[51].mxu0 }
 0xcaf   :  { %v4933_v28 = vpop.f32.mrb[72].mxu1 }
 0xcb0   :  { %v3846_v39 = vpop.f32.mrb[73].mxu1 }
 0xcb1   :  { %v2431_v29 = vpop.f32.mrb[74].mxu1 }
 0xcb2   :  { %v3847_v38 = vpop.f32.mrb[75].mxu1 }
 0xd00   :  { %v2474_v30 = vpop.f32.mrb[52].mxu0 }
 0xd01   :  { %v3852_v33 = vpop.f32.mrb[53].mxu0 }
 0xd02   :  { %v2477_v35 = vpop.f32.mrb[54].mxu0  ;;  %v4055_v33 = vld [vmem:[#allocation8 + $0x14] ss:$8 sps:$4 sm:$0xff]  }
 0xd03   :  { %v3853_v42 = vpop.f32.mrb[55].mxu0  ;;  %v4053_v35 = vld [vmem:[#allocation8 + $0x10] ss:$8 sps:$4 sm:$0xff]  }
 0xd08   :  { %v2520_v34 = vpop.f32.mrb[76].mxu1 }
 0xd09   :  { %v3955_v25 = vpack.i.bf16 %v2520_v34, %v2474_v30  ;;  %v3858_v40 = vpop.f32.mrb[77].mxu1  ;;  %v4050_v30 = vld [vmem:[#allocation8] ss:$8 sps:$4 sm:$0xff]  }
 0xd0a   :  { %v2523_v31 = vpop.f32.mrb[78].mxu1  ;;  %3009 = vmatpush1.bf16.msra.mxu1 %v4050_v30 }
 0xd0b   :  { %3956 = vrot.lane.b32.xlu1 %v3955_v25, %s4349_s25  ;;  %v3859_v19 = vpop.f32.mrb[79].mxu1  ;;  %3010 = vmatprep.subr.bf16.mxu1 %v4055_v33  ;;  %v4058_v31 = vld [vmem:[#allocation8 + $0x24] ss:$8 sps:$4 sm:$0xff]   ;;  %v3446_v33 = vld [vmem:[%s5004_s8 + $0x1] ss:$0 sm:$0xff] }
 0xd0c   :  { %v4061_v19 = vld [vmem:[#allocation8 + $0x34] ss:$8 sps:$4 sm:$0xff]  }
 0xd0e   :  { %3011 = vmatpush1.bf16.msra.mxu1 %v4053_v35 }
 0xd0f   :  { %3012 = vmatprep.subr.bf16.mxu1 %v4058_v31 }
 0xd10   :  { %v2612_v47 = vpop.f32.mrb[80].mxu1 }
 0xd11   :  { %v3870_v51 = vpop.f32.mrb[81].mxu1 }
 0xd12   :  { %v2615_v53 = vpop.f32.mrb[82].mxu1  ;;  %3013 = vmatpush1.bf16.msra.mxu1 %v4056_v44  ;;  %v4062_v51 = vld [vmem:[#allocation8 + $0x40] ss:$8 sps:$4 sm:$0xff]  }
 0xd13   :  { %v3871_v54 = vpop.f32.mrb[83].mxu1  ;;  %3014 = vmatprep.subr.bf16.mxu1 %v4061_v19  ;;  %v4067_v53 = vld [vmem:[#allocation8 + $0x54] ss:$8 sps:$4 sm:$0xff]  }
 0xd14   :  { %v4065_v54 = vld [vmem:[#allocation8 + $0x50] ss:$8 sps:$4 sm:$0xff]  }
 0xd16   :  { %3015 = vmatpush1.bf16.msra.mxu1 %v4059_v45 }
 0xd32   :  { %v2704_v48 = vpop.f32.mrb[84].mxu1 }
 0xd33   :  { %v3882_v56 = vpop.f32.mrb[85].mxu1 }
 0xd34   :  { %v2707_v58 = vpop.f32.mrb[86].mxu1  ;;  %v4071_v56 = vld [vmem:[#allocation8 + $0x70] ss:$8 sps:$4 sm:$0xff]  }
 0xd35   :  { %v2566_v59 = vpop.f32.mrb[56].mxu0  ;;  %v3883_v49 = vpop.f32.mrb[87].mxu1  ;;  %v4074_v58 = vld [vmem:[#allocation10] ss:$8 sps:$4 sm:$0xff]  }
 0xd36   :  { %v3960_v60 = vpack.i.bf16 %v2612_v47, %v2566_v59  ;;  %v3864_v63 = vpop.f32.mrb[57].mxu0  ;;  %v4064_v47 = vld [vmem:[#allocation8 + $0x44] ss:$8 sps:$4 sm:$0xff]   ;;  %v4079_v59 = vld [vmem:[#allocation10 + $0x14] ss:$8 sps:$4 sm:$0xff]  }
 0xd37   :  { %v2569_v57 = vpop.f32.mrb[58].mxu0  ;;  %3016 = vmatprep.subr.bf16.mxu1 %v4064_v47  ;;  %v4077_v49 = vld [vmem:[#allocation10 + $0x10] ss:$8 sps:$4 sm:$0xff]   ;;  %v4080_v63 = vld [vmem:[#allocation10 + $0x20] ss:$8 sps:$4 sm:$0xff]  }
 0xd38   :  { %v3865_v61 = vpop.f32.mrb[59].mxu0  ;;  %3961 = vrot.lane.b32.xlu0 %v3960_v60, %s4342_s2  ;;  %3017 = vmatpush1.bf16.msra.mxu1 %v4062_v51  ;;  %v4082_v60 = vld [vmem:[#allocation10 + $0x24] ss:$8 sps:$4 sm:$0xff]   ;;  %v4085_v57 = vld [vmem:[#allocation10 + $0x34] ss:$8 sps:$4 sm:$0xff]  }
 0xd39   :  { %3018 = vmatprep.subr.bf16.mxu1 %v4067_v53  ;;  %v4083_v61 = vld [vmem:[#allocation10 + $0x30] ss:$8 sps:$4 sm:$0xff]  }
 0xd3c   :  { %3019 = vmatpush1.bf16.msra.mxu1 %v4065_v54 }
 0xd3d   :  { %v2658_v62 = vpop.f32.mrb[60].mxu0  ;;  %3020 = vmatprep.subr.bf16.mxu1 %v4070_v55 }
 0xd3e   :  { %v3965_v46 = vpack.i.bf16 %v2704_v48, %v2658_v62  ;;  %v3876_v1 = vpop.f32.mrb[61].mxu0  ;;  %v4073_v48 = vld [vmem:[#allocation8 + $0x74] ss:$8 sps:$4 sm:$0xff]   ;;  %v4088_v62 = vld [vmem:[#allocation10 + $0x44] ss:$8 sps:$4 sm:$0xff]  }
 0xd3f   :  { %v2661_v2 = vpop.f32.mrb[62].mxu0  ;;  %v4091_v1 = vld [vmem:[#allocation10 + $0x54] ss:$8 sps:$4 sm:$0xff]  }
 0xd40   :  { %v3877_v4 = vpop.f32.mrb[63].mxu0  ;;  %3966 = vrot.lane.b32.xlu1 %v3965_v46, %s4348_s24  ;;  %3021 = vmatpush1.bf16.msra.mxu1 %v4068_v37  ;;  %v4086_v46 = vld [vmem:[#allocation10 + $0x40] ss:$8 sps:$4 sm:$0xff]   ;;  %v4089_v2 = vld [vmem:[#allocation10 + $0x50] ss:$8 sps:$4 sm:$0xff]  }
 0xd41   :  { %3022 = vmatprep.subr.bf16.mxu1 %v4073_v48  ;;  %v4094_v4 = vld [vmem:[#allocation10 + $0x64] ss:$8 sps:$4 sm:$0xff]  }
 0xd44   :  { %3023 = vmatpush1.bf16.msra.mxu1 %v4071_v56 }
 0xd7d   :  { %v3957_v3 = vpop.permute.xlu1 %3956 }
 0xd7e   :  { %v3959_v5 = vunpack.i.h.bf16 %v3957_v3  ;;  %v3958_v7 = vunpack.i.l.bf16 %v3957_v3  ;;  %v4092_v3 = vld [vmem:[#allocation10 + $0x60] ss:$8 sps:$4 sm:$0xff]  }
 0xd80   :  { %v2735_v14 = vsel %vm544_vm4, %v4933_v28, %v3959_v5  ;;  %v2734_v13 = vsel %vm544_vm4, %v4931_v0, %v3958_v7  ;;  %v4095_v5 = vld [vmem:[#allocation10 + $0x70] ss:$8 sps:$4 sm:$0xff]   ;;  %v4100_v7 = vld [vmem:[#allocation10 + $0x84] ss:$8 sps:$4 sm:$0xff]  }
 0xdaa   :  { %v3962_v24 = vpop.permute.xlu0 %3961 }
 0xdab   :  { %v3964_v9 = vunpack.i.h.bf16 %v3962_v24  ;;  %v3963_v10 = vunpack.i.l.bf16 %v3962_v24  ;;  %v4097_v24 = vld [vmem:[#allocation10 + $0x74] ss:$8 sps:$4 sm:$0xff]  }
 0xdad   :  { %v2737_v16 = vsel %vm138_vm0, %v2735_v14, %v3964_v9  ;;  %v2736_v18 = vsel %vm138_vm0, %v2734_v13, %v3963_v10  ;;  %v4098_v9 = vld [vmem:[#allocation10 + $0x80] ss:$8 sps:$4 sm:$0xff]   ;;  %v4103_v10 = vld [vmem:[#allocation10 + $0x94] ss:$8 sps:$4 sm:$0xff]   ;;  %v4106_v14 = vld [vmem:[#allocation10 + $0xa4] ss:$8 sps:$4 sm:$0xff]  }
 0xdae   :  { %v4104_v13 = vld [vmem:[#allocation10 + $0xa0] ss:$8 sps:$4 sm:$0xff]  }
 0xdb2   :  { %v3967_v11 = vpop.permute.xlu1 %3966 }
 0xdb3   :  { %v3969_v6 = vunpack.i.h.bf16 %v3967_v11  ;;  %v3968_v12 = vunpack.i.l.bf16 %v3967_v11  ;;  %v4101_v11 = vld [vmem:[#allocation10 + $0x90] ss:$8 sps:$4 sm:$0xff]  }
 0xdb5   :  { %v2739_v20 = vsel %vm1407_vm7, %v2737_v16, %v3969_v6  ;;  %v2738_v17 = vsel %vm1407_vm7, %v2736_v18, %v3968_v12  ;;  %v4109_v6 = vld [vmem:[#allocation10 + $0xb4] ss:$8 sps:$4 sm:$0xff]   ;;  %v4107_v12 = vld [vmem:[#allocation10 + $0xb0] ss:$8 sps:$4 sm:$0xff]   ;;  %v4112_v16 = vld [vmem:[#allocation10 + $0xc4] ss:$8 sps:$4 sm:$0xff]  }
 0xdb6   :  { %v2740_v21 = vpack.c.bf16 %v2739_v20, %v2738_v17  ;;  %v4110_v18 = vld [vmem:[#allocation10 + $0xc0] ss:$8 sps:$4 sm:$0xff]   ;;  %v4115_v20 = vld [vmem:[#allocation10 + $0xd4] ss:$8 sps:$4 sm:$0xff]   ;;  %v4113_v17 = vld [vmem:[#allocation10 + $0xd0] ss:$8 sps:$4 sm:$0xff]  }
 0xdb8   :  { %3901 = vmatmul.mubr.bf16.vlgmr.msra.gmra.mrb[64].mxu0 %v2740_v21 }
 0xdb9   :  { %3262 = vmatpush1.bf16.msra.mxu0 %v4074_v58 }
 0xdba   :  { %3263 = vmatprep.subr.bf16.mxu0 %v4079_v59 }
 0xdbd   :  { %3264 = vmatpush1.bf16.msra.mxu0 %v4077_v49 }
 0xdbe   :  { %3265 = vmatprep.subr.bf16.mxu0 %v4082_v60  ;;  %v3089_v60 = vld [vmem:[%s5008_s12] sm:$0x3]  ;;  %s4304_s12 = scalar_lea.vmem %s3314_s11, 512 }
 0xdbf   :  { %p4305_p12 = scmp.ne.s32.totalorder %s3314_s11, %s4304_s12  ;;  %p4310_p0 = scmp.lt.s32.totalorder %s4304_s12, %s4304_s12 }
 0xdc1   :  { %3266 = vmatpush1.bf16.msra.mxu0 %v4080_v63  ;;  %v3094_v63 = vrot.slane %v3089_v60, %v4531_v50  ;;  %p4311_p1 = por %p4310_p0, %p4309_p13 }
 0xdc2   :  { %3267 = vmatprep.subr.bf16.mxu0 %v4085_v57  ;;  %v3098_v57 = vrot.slane %v3089_v60, %v4537_v52 }
 0xdc3   :  { %p4312_p2 = pnand %p4311_p1, %p4305_p12 }
 0xdc5   :  { %3268 = vmatpush1.bf16.msra.mxu0 %v4083_v61 }
 0xdc6   :  { %3269 = vmatprep.subr.bf16.mxu0 %v4088_v62 }
 0xdc9   :  { %3270 = vmatpush1.bf16.msra.mxu0 %v4086_v46 }
 0xdca   :  { %3271 = vmatprep.subr.bf16.mxu0 %v4091_v1 }
 0xdcd   :  { %3272 = vmatpush1.bf16.msra.mxu0 %v4089_v2 }
 0xdce   :  { %3273 = vmatprep.subr.bf16.mxu0 %v4094_v4 }
 0xdd1   :  { %3274 = vmatpush1.bf16.msra.mxu0 %v4092_v3 }
 0xdd2   :  { %3275 = vmatprep.subr.bf16.mxu0 %v4097_v24 }
 0xdd5   :  { %3276 = vmatpush1.bf16.msra.mxu0 %v4095_v5 }
 0xdd6   :  { %3277 = vmatprep.subr.bf16.mxu0 %v4100_v7 }
 0xdd9   :  { %3278 = vmatpush1.bf16.msra.mxu0 %v4098_v9 }
 0xdda   :  { %3279 = vmatprep.subr.bf16.mxu0 %v4103_v10 }
 0xddd   :  { %3280 = vmatpush1.bf16.msra.mxu0 %v4101_v11 }
 0xdde   :  { %3281 = vmatprep.subr.bf16.mxu0 %v4106_v14 }
 0xde1   :  { %3282 = vmatpush1.bf16.msra.mxu0 %v4104_v13 }
 0xde2   :  { %3283 = vmatprep.subr.bf16.mxu0 %v4109_v6 }
 0xde5   :  { %3284 = vmatpush1.bf16.msra.mxu0 %v4107_v12 }
 0xde6   :  { %3285 = vmatprep.subr.bf16.mxu0 %v4112_v16 }
 0xde9   :  { %3286 = vmatpush1.bf16.msra.mxu0 %v4110_v18 }
 0xdea   :  { %3287 = vmatprep.subr.bf16.mxu0 %v4115_v20 }
 0xded   :  { %3288 = vmatpush1.bf16.msra.mxu0 %v4113_v17 }
 0xe8b   :  { %v2848_v23 = vpop.f32.mrb[64].mxu0 }
 0xe8c   :  { %v2849_v26 = vadd.f32 %v3434_v22, %v2848_v23  ;;  %v3902_v27 = vpop.f32.mrb[65].mxu0 }
 0xe8d   :  { %v2851_v0 = vpop.f32.mrb[66].mxu0 }
 0xe8e   :  { %v2852_v28 = vadd.f32 %v3434_v22, %v2851_v0  ;;  %v3903_v39 = vpop.f32.mrb[67].mxu0  ;;  %v2855_v29 = vadd.f32 %v2849_v26, %v4749_v15 }
 0xe90   :  { %2857 = vadd.xlane.f32.xlu0 %v2855_v29  ;;  %v2856_v38 = vadd.f32 %v2852_v28, %v4751_v8 }
 0xe92   :  { %2859 = vadd.xlane.f32.xlu1 %v2856_v38 }
 0xf1d   :  { %v2858_v36 = vpop.xlane.xlu0 %2857 }
 0xf1e   :  { %v2861_v42 = vmul.f32 0.0078125, %v2858_v36 }
 0xf1f   :  { %v2860_v43 = vpop.xlane.xlu1 %2859 }
 0xf20   :  { %v4958_v34 = vsub.f32 %v2855_v29, %v2861_v42  ;;  %v2862_v25 = vmul.f32 0.0078125, %v2860_v43  ;;  %v3444_v29 = vld [vmem:[%s5003_s7 + $0x1] ss:$0 sm:$0xff] }
 0xf22   :  { %v4960_v40 = vsub.f32 %v2856_v38, %v2862_v25  ;;  %v2865_v15 = vmul.f32 %v4958_v34, %v4958_v34  ;;  %v4118_v25 = vld [vmem:[#allocation10 + $0xe4] ss:$8 sps:$4 sm:$0xff]  }
 0xf23   :  { %3289 = vmatprep.subr.bf16.mxu0 %v4118_v25 }
 0xf24   :  { %2867 = vadd.xlane.f32.xlu0 %v2865_v15  ;;  %v2866_v8 = vmul.f32 %v4960_v40, %v4960_v40  ;;  %v4116_v15 = vld [vmem:[#allocation10 + $0xe0] ss:$8 sps:$4 sm:$0xff]  }
 0xf25   :  { %3290 = vmatpush1.bf16.msra.mxu0 %v4116_v15 }
 0xf28   :  { %2869 = vadd.xlane.f32.xlu0 %v2866_v8  ;;  %v4119_v8 = vld [vmem:[#allocation10 + $0xf0] ss:$8 sps:$4 sm:$0xff]  }
 0xfb1   :  { %v2868_v21 = vpop.xlane.xlu0 %2867 }
 0xfb2   :  { %v2871_v22 = vmul.f32 0.0078125, %v2868_v21 }
 0xfb4   :  { %v2873_v23 = vadd.f32 1e-05, %v2871_v22 }
 0xfb5   :  { %v2870_v26 = vpop.xlane.xlu0 %2869 }
 0xfb6   :  { %4190 = vrsqrt.f32 %v2873_v23  ;;  %v2872_v27 = vmul.f32 0.0078125, %v2870_v26 }
 0xfb8   :  { %v2874_v0 = vadd.f32 1e-05, %v2872_v27 }
 0xfba   :  { %4192 = vrsqrt.f32 %v2874_v0 }
 0xfc0   :  { %v4191_v28 = vpop.eup %4190 }
 0xfc1   :  { %v2877_v39 = vmul.f32 %v4191_v28, %v4958_v34  ;;  %v4121_v34 = vld [vmem:[#allocation10 + $0xf4] ss:$8 sps:$4 sm:$0xff]  }
 0xfc2   :  { %3291 = vmatprep.subr.bf16.mxu0 %v4121_v34 }
 0xfc3   :  { %v2887_v32 = vmul.f32 %v3444_v29, %v2877_v39  ;;  %3292 = vmatpush1.bf16.msra.mxu0 %v4119_v8 }
 0xfc4   :  { %v4193_v38 = vpop.eup %4192 }
 0xfc5   :  { %v2878_v30 = vmul.f32 %v4193_v38, %v4960_v40  ;;  %v2897_v36 = vadd.f32 %v3446_v33, %v2887_v32  ;;  %v2916_v40 = vld [vmem:[%s5006_s10] sm:$0x3] }
 0xfc6   :  { %v2921_v31 = vrot.slane %v2916_v40, %v4531_v50  ;;  %v2925_v44 = vrot.slane %v2916_v40, %v4537_v52 }
 0xfc7   :  { %v2888_v35 = vmul.f32 %v3444_v29, %v2878_v30 }
 0xfc9   :  { %v2898_v42 = vadd.f32 %v3446_v33, %v2888_v35 }
 0xfcb   :  { %v2899_v43 = vpack.c.bf16 %v2898_v42, %v2897_v36 }
 0xfcd   :  { %3041 = vmatmul.mubr.bf16.vlgmr.msra.gmra.mrb[88].mxu1 %v2899_v43 }
0x10a0   :  { %v3042_v19 = vpop.f32.mrb[88].mxu1 }
0x10a1   :  { %v3043_v45 = vadd.f32 %v3042_v19, %v2921_v31  ;;  %v3044_v47 = vpop.f32.mrb[89].mxu1 }
0x10a2   :  { %v3045_v51 = vadd.f32 %v3044_v47, %v2925_v44  ;;  %v3046_v53 = vpop.f32.mrb[90].mxu1 }
0x10a3   :  { %v3047_v54 = vadd.f32 %v3046_v53, %v2921_v31  ;;  %v3048_v55 = vpop.f32.mrb[91].mxu1  ;;  %v3051_v48 = vmax.f32 %v3043_v45, 0.0 }
0x10a4   :  { %v3049_v37 = vadd.f32 %v3048_v55, %v2925_v44  ;;  %v3052_v58 = vmax.f32 %v3045_v51, 0.0 }
0x10a5   :  { %v3053_v56 = vmax.f32 %v3047_v54, 0.0 }
0x10a6   :  { %v3054_v41 = vmax.f32 %v3049_v37, 0.0 }
0x10a7   :  { %v3055_v59 = vpack.c.bf16 %v3053_v56, %v3051_v48 }
0x10a8   :  { %v3056_v49 = vpack.c.bf16 %v3054_v41, %v3052_v58 }
0x10aa   :  { %3293 = vmatprep.mubr.bf16.mxu0 %v3056_v49 }
0x10ab   :  { %3294 = vmatmul.mubr.bf16.vlgmr.msra.gmra.mrb[68].mxu0 %v3055_v59 }
0x117e   :  { %v3295_v61 = vpop.f32.mrb[68].mxu0 }
0x117f   :  { %v3296_v62 = vadd.f32 %v3295_v61, %v3094_v63  ;;  %v3297_v46 = vpop.f32.mrb[69].mxu0 }
0x1180   :  { %v3298_v1 = vadd.f32 %v3297_v46, %v3098_v57  ;;  %v3299_v2 = vpop.f32.mrb[70].mxu0 }
0x1181   :  { %3304 = vst [vmem:[#allocation11] sm:$0xff] %v3296_v62  ;;  %v3300_v4 = vadd.f32 %v3299_v2, %v3094_v63  ;;  %v3301_v3 = vpop.f32.mrb[71].mxu0 }
0x1182   :  { %3305 = vst [vmem:[#allocation11 + $0x8] sm:$0xff] %v3298_v1  ;;  %v3302_v24 = vadd.f32 %v3301_v3, %v3098_v57 }
0x1183   :  { %3306 = vst [vmem:[#allocation11 + $0x10] sm:$0xff] %v3300_v4 }
0x1184   :  { %3307 = vst [vmem:[#allocation11 + $0x18] sm:$0xff] %v3302_v24 }
0x1185   :  { %4315 = shalt.err (!%p4312_p2)
}
0x1186   :  { %s4316_s17 = scalar_lea.hbm %s5009_s13, 512 }
0x1187   :  { %p4317_p3 = scmp.ne.s32.totalorder %s5009_s13, %s4316_s17  ;;  %p4320_p4 = scmp.lt.u32.totalorder %s4316_s17, %s5009_s13 }
0x1189   :  { %p4322_p5 = pnand %p4320_p4, %p4317_p3 }
0x118b   :  { %4325 = shalt.err (!%p4322_p5)
}
0x118c   :  { %s4351_s29 = smov 256   ;;  %s4352_s30 = smov 16  }
0x118d   :  { %3319 = dma.vmem_to_hbm [thread:$0]  %s3314_s11, 512, %s5009_s13, [#allocation4], %s4351_s29, %s4351_s29, %s4352_s30  }
0x118e   :  { %4332 = dma.done.wait [#allocation4], 512  }
0x118f   :  { %4333 = vsyncadd [#allocation4], 4294966784 }
0x1190   :  { %3323 = vsyncpa [#allocation3], 1 }
0x1191   :  { %3324 = vsyncpa [#allocation6], 1 }
0x1192   :  { %3325 = vsyncpa [#allocation9], 1 }
0x1193   :  { %3326 = vsyncpa [#allocation4], 1 }

</bundles_post_ra>
